<compile_context>
chip_gen: v6e
topology: v6e:2x2x1
jax: 0.10.0
libtpu: 0.0.40
codegen_flags: <defaults>
</compile_context>

<pallas_src>
import functools

import jax
import jax.numpy as jnp
from jax.experimental import pallas as pl
from jax.experimental.pallas import tpu as pltpu


LANE = 128
SUBLANE = 8


def _round_up(x, m):
    return (x + m - 1) // m * m


# ----------------------------- Pallas kernel ------------------------------- #
def _fused_kernel(
    cls_ids_ref,   # SMEM (Bp,)  int32  scalar-prefetched CLS token ids
    vmean_ref,     # VMEM (TB, C)  f32  spatial mean of pixel values
    labels_ref,    # VMEM (TB, 1)  int32 class labels (vector compare needs VMEM)
    emb_hbm,       # ANY  (V, Ht)  f32  embedding table, stays in HBM
    w_vis_ref,     # (C, Hv)  bf16   vision pooler projection (ResNet stand-in)
    b_vis_ref,     # (1, Hv)  f32
    w_pc_ref,      # (Ht, Ht) bf16   pre_classifier_distilbert
    b_pc_ref,      # (1, Ht)  f32
    w_t_ref,       # (Ht, P)  bf16   text_map
    b_t_ref,       # (1, P)   f32
    w_v_ref,       # (Hv, P)  bf16   image_map
    b_v_ref,       # (1, P)   f32
    w_ct_ref,      # (P, Lp)  bf16   classifier weight, text half
    w_cv_ref,      # (P, Lp)  bf16   classifier weight, image half
    b_c_ref,       # (1, Lp)  f32    padded columns hold -1e30 (softmax mask)
    logits_ref,    # out: (TB, Lp) f32  lane-dense; wrapper slices to (B, L)
    rowloss_ref,   # out: (TB, 1)  f32  per-row CE contribution (0 on pad rows)
    t_cls_buf,     # scratch VMEM (TB, Ht) f32 — gathered CLS embeddings
    copy_sem,      # scratch DMA semaphores (TB,)
    *,
    tb: int,
    real_b: int,
):
    base = pl.program_id(0) * tb

    # ---- text encoder stand-in: per-row CLS embedding gather (manual DMA) ----
    # Only `tb` rows of the table ever leave HBM; the table itself is never
    # VMEM-resident (critical at the real 30522x768 vocab / on v7x 64 MiB VMEM).
    for r in range(tb):
        row = cls_ids_ref[base + r]
        pltpu.make_async_copy(
            emb_hbm.at[pl.ds(row, 1), :], t_cls_buf.at[pl.ds(r, 1), :],
            copy_sem.at[r]).start()
    for r in range(tb):
        pltpu.make_async_copy(
            emb_hbm.at[pl.ds(0, 1), :], t_cls_buf.at[pl.ds(r, 1), :],
            copy_sem.at[r]).wait()

    # ---- vision encoder stand-in: pooled pixels -> vision hidden size ----
    v_pool = jnp.dot(vmean_ref[...].astype(jnp.bfloat16), w_vis_ref[...],
                     preferred_element_type=jnp.float32) + b_vis_ref[...]

    # ---- distilbert path: pre_classifier -> ReLU (dropout identity in eval) ----
    pooled = jnp.dot(t_cls_buf[...].astype(jnp.bfloat16), w_pc_ref[...],
                     preferred_element_type=jnp.float32) + b_pc_ref[...]
    pooled = jnp.maximum(pooled, 0.0)

    # ---- text_map / image_map (Linear; Dropout(0.2) identity in eval) ----
    text_embeds = jnp.dot(pooled.astype(jnp.bfloat16), w_t_ref[...],
                          preferred_element_type=jnp.float32) + b_t_ref[...]
    image_embeds = jnp.dot(v_pool.astype(jnp.bfloat16), w_v_ref[...],
                           preferred_element_type=jnp.float32) + b_v_ref[...]

    # ---- L2 normalisation via rsqrt (EUP); no eps, matching x / x.norm() ----
    text_embeds = text_embeds * jax.lax.rsqrt(
        jnp.sum(text_embeds * text_embeds, axis=-1, keepdims=True))
    image_embeds = image_embeds * jax.lax.rsqrt(
        jnp.sum(image_embeds * image_embeds, axis=-1, keepdims=True))

    # ---- classifier: split halves == cat([text, image]) @ W, without the
    #      lane-axis concat/relayout.  Padding-column mask lives in b_c. ----
    logits = (jnp.dot(text_embeds.astype(jnp.bfloat16), w_ct_ref[...],
                      preferred_element_type=jnp.float32)
              + jnp.dot(image_embeds.astype(jnp.bfloat16), w_cv_ref[...],
                        preferred_element_type=jnp.float32)
              + b_c_ref[...])
    logits_ref[...] = logits

    # ---- per-row CrossEntropyLoss contribution (padded rows -> 0) ----
    lp = logits.shape[-1]
    m = jnp.max(logits, axis=-1, keepdims=True)
    lse = jnp.log(jnp.sum(jnp.exp(logits - m), axis=-1, keepdims=True)) + m
    lab_iota = jax.lax.broadcasted_iota(jnp.int32, (tb, lp), 1)
    onehot = jnp.where(lab_iota == labels_ref[...], 1.0, 0.0)
    picked = jnp.sum(logits * onehot, axis=-1, keepdims=True)
    row_idx = base + jax.lax.broadcasted_iota(jnp.int32, (tb, 1), 0)
    rowloss_ref[...] = jnp.where(row_idx < real_b, lse - picked, 0.0)


# ------------------------------ full forward -------------------------------- #
def multimodal_forward(pixel_values, input_ids, attention_mask, labels, params,
                       *, num_labels, block_b=SUBLANE):
    """Fused encoder stand-ins + classification head. Returns (loss, logits)."""
    del attention_mask   # interface parity with the module; unused by the stub
    B = input_ids.shape[0]
    Bp = _round_up(B, block_b)
    pad = Bp - B

    # Vision stand-in pooling: reduce trailing HxW directly (no NCHW->NHWC
    # transpose); only a (B, C) slab crosses HBM as an activation.
    v_mean = jnp.mean(pixel_values, axis=(2, 3))                      # (B, C)
    cls_ids = input_ids[:, 0].astype(jnp.int32)                       # (B,)
    labels_i = labels.astype(jnp.int32)                               # (B,)
    if pad:
        v_mean = jnp.pad(v_mean, ((0, pad), (0, 0)))
        cls_ids = jnp.pad(cls_ids, (0, pad))        # pad rows gather row 0
        labels_i = jnp.pad(labels_i, (0, pad))      # masked out of the loss
    labels2d = labels_i.reshape(Bp, 1)

    c = v_mean.shape[1]
    vocab, ht = params["emb_table"].shape
    hv = params["w_vis"].shape[1]
    proj = params["w_t"].shape[1]
    lp = params["b_c"].shape[-1]

    def batch_spec(last):
        return pl.BlockSpec((block_b, last), lambda i, ids: (i, 0))

    def whole(arr):   # weight stays VMEM-resident (constant index map)
        return pl.BlockSpec(arr.shape, lambda i, ids: (0, 0))

    in_specs = [
        batch_spec(c),                         # v_mean
        batch_spec(1),                         # labels
        pl.BlockSpec(memory_space=pl.ANY),     # emb_table: raw HBM ref
        whole(params["w_vis"]), whole(params["b_vis"]),
        whole(params["w_pc"]), whole(params["b_pc"]),
        whole(params["w_t"]), whole(params["b_t"]),
        whole(params["w_v"]), whole(params["b_v"]),
        whole(params["w_ct"]), whole(params["w_cv"]), whole(params["b_c"]),
    ]
    out_specs = [
        pl.BlockSpec((block_b, lp), lambda i, ids: (i, 0)),   # logits (lane-dense)
        pl.BlockSpec((block_b, 1), lambda i, ids: (i, 0)),    # per-row loss
    ]

    flops = 2 * Bp * (c * hv + ht * ht + ht * proj + hv * proj + 2 * proj * lp)
    bytes_accessed = (
        Bp * ht * 4                                    # gathered embedding rows
        + Bp * (c + 1) * 4 + Bp * (lp + 1) * 4 + Bp * 4
        + sum(int(params[k].size) * params[k].dtype.itemsize
              for k in ("w_vis", "b_vis", "w_pc", "b_pc", "w_t", "b_t",
                        "w_v", "b_v", "w_ct", "w_cv", "b_c")))
    cost = pl.CostEstimate(flops=int(flops),
                           transcendentals=int(Bp * (lp + 3)),
                           bytes_accessed=int(bytes_accessed))

    logits_pad, rowloss = pl.pallas_call(
        functools.partial(_fused_kernel, tb=block_b, real_b=B),
        out_shape=(
            jax.ShapeDtypeStruct((Bp, lp), jnp.float32),
            jax.ShapeDtypeStruct((Bp, 1), jnp.float32),
        ),
        grid_spec=pltpu.PrefetchScalarGridSpec(
            num_scalar_prefetch=1,
            grid=(Bp // block_b,),
            in_specs=in_specs,
            out_specs=out_specs,
            scratch_shapes=[
                pltpu.VMEM((block_b, ht), jnp.float32),     # gathered CLS rows
                pltpu.SemaphoreType.DMA((block_b,)),
            ]),
        compiler_params=pltpu.CompilerParams(
            dimension_semantics=("parallel",)),             # 2 TCs on v7x
        cost_estimate=cost,
    )(cls_ids, v_mean, labels2d,
      params["emb_table"], params["w_vis"], params["b_vis"],
      params["w_pc"], params["b_pc"], params["w_t"], params["b_t"],
      params["w_v"], params["b_v"],
      params["w_ct"], params["w_cv"], params["b_c"])

    loss = jnp.sum(rowloss) / B                       # mean over *real* batch
    return loss, logits_pad[:B, :num_labels]


@functools.partial(jax.jit, static_argnames=("num_labels",))
def forward(pixel_values, input_ids, attention_mask, labels, params, *, num_labels):
    return multimodal_forward(pixel_values, input_ids, attention_mask, labels,
                              params, num_labels=num_labels)


# --------------------------------- params ----------------------------------- #
def make_params(key, *, vocab, text_hidden, img_channels, vision_hidden,
                proj_dim, num_labels):
    ks = jax.random.split(key, 10)
    scale = 0.02
    lp = _round_up(num_labels, LANE)
    bf = jnp.bfloat16

    def init(k, shape):
        return scale * jax.random.normal(k, shape, jnp.float32)

    # Classifier stored as two halves (text rows / image rows of the original
    # (2P, L) weight) with the output dim lane-padded to 128.
    w_c = init(ks[8], (2 * proj_dim, num_labels))
    w_c_pad = jnp.zeros((2 * proj_dim, lp), jnp.float32).at[:, :num_labels].set(w_c)
    b_c = init(ks[9], (1, num_labels))
    # Fold the label-padding mask into the bias: padded columns -> -1e30 so the
    # kernel's softmax needs no iota/where; wrapper slices them off the logits.
    b_c_pad = jnp.full((1, lp), -1e30, jnp.float32).at[:, :num_labels].set(b_c)

    return {
        # encoder stand-ins; emb_table stays f32 in HBM (row-gathered by DMA)
        "emb_table": init(ks[0], (vocab, text_hidden)),
        "w_vis": init(ks[1], (img_channels, vision_hidden)).astype(bf),
        "b_vis": jnp.zeros((1, vision_hidden), jnp.float32),
        # module parameters, stored as (in_features, out_features)
        "w_pc": init(ks[2], (text_hidden, text_hidden)).astype(bf),
        "b_pc": init(ks[3], (1, text_hidden)),
        "w_t": init(ks[4], (text_hidden, proj_dim)).astype(bf),
        "b_t": init(ks[5], (1, proj_dim)),
        "w_v": init(ks[6], (vision_hidden, proj_dim)).astype(bf),
        "b_v": init(ks[7], (1, proj_dim)),
        "w_ct": w_c_pad[:proj_dim].astype(bf),
        "w_cv": w_c_pad[proj_dim:].astype(bf),
        "b_c": b_c_pad,
    }


# --------------------------------- main ------------------------------------- #
if __name__ == "__main__":
    # Small shapes consistent with the module's forward signature.
    B, C, HW, S = 2, 3, 16, 8
    VOCAB, TEXT_HIDDEN, VISION_HIDDEN = 100, 32, 64
    PROJ_DIM, NUM_LABELS = 256, 4      # class_label != 'toxic-symbols' -> 256

    key = jax.random.PRNGKey(0)
    k_px, k_ids, k_lab, k_par = jax.random.split(key, 4)

    pixel_values = jax.random.normal(k_px, (B, C, HW, HW), jnp.float32)   # NCHW
    input_ids = jax.random.randint(k_ids, (B, S), 0, VOCAB, jnp.int32)
    attention_mask = jnp.ones((B, S), jnp.int32)
    labels = jax.random.randint(k_lab, (B,), 0, NUM_LABELS, jnp.int32)

    params = make_params(
        k_par, vocab=VOCAB, text_hidden=TEXT_HIDDEN, img_channels=C,
        vision_hidden=VISION_HIDDEN, proj_dim=PROJ_DIM, num_labels=NUM_LABELS)

    loss, logits = forward(pixel_values, input_ids, attention_mask, labels,
                           params, num_labels=NUM_LABELS)
    jax.block_until_ready((loss, logits))

    assert logits.shape == (B, NUM_LABELS)
    assert loss.shape == ()
    assert bool(jnp.isfinite(loss))
    print("KERNEL_OK")
</pallas_src>

<mosaic_0001>
module attributes {stable_mosaic.version = 11 : i64} {
  func.func @_fused_kernel(%arg0: i32, %arg1: memref<8xi32, #tpu.memory_space<smem>>, %arg2: memref<8x3xf32, #tpu.memory_space<vmem>>, %arg3: memref<8x1xi32, #tpu.memory_space<vmem>>, %arg4: memref<100x32xf32, #tpu.memory_space<any>>, %arg5: memref<3x64xbf16, #tpu.memory_space<vmem>>, %arg6: memref<1x64xf32, #tpu.memory_space<vmem>>, %arg7: memref<32x32xbf16, #tpu.memory_space<vmem>>, %arg8: memref<1x32xf32, #tpu.memory_space<vmem>>, %arg9: memref<32x256xbf16, #tpu.memory_space<vmem>>, %arg10: memref<1x256xf32, #tpu.memory_space<vmem>>, %arg11: memref<64x256xbf16, #tpu.memory_space<vmem>>, %arg12: memref<1x256xf32, #tpu.memory_space<vmem>>, %arg13: memref<256x128xbf16, #tpu.memory_space<vmem>>, %arg14: memref<256x128xbf16, #tpu.memory_space<vmem>>, %arg15: memref<1x128xf32, #tpu.memory_space<vmem>>, %arg16: memref<8x128xf32, #tpu.memory_space<vmem>>, %arg17: memref<8x1xf32, #tpu.memory_space<vmem>>, %arg18: memref<8x32xf32, #tpu.memory_space<vmem>>, %arg19: memref<8x!tpu.dma_semaphore, #tpu.memory_space<semaphore_mem>>) attributes {dimension_semantics = [#tpu.dimension_semantics<parallel>], iteration_bounds = array<i64: 1>, scalar_prefetch = 1 : i64, scratch_operands = 2 : i64, tpu.core_type = #tpu.core_type<tc>, window_params = [{transform_indices = @transform_0, window_bounds = array<i64: 8, 3>}, {transform_indices = @transform_1, window_bounds = array<i64: 8, 1>}, {}, {pipeline_mode = #tpu.pipeline_mode<synchronous>, transform_indices = @transform_3, window_bounds = array<i64: 3, 64>}, {pipeline_mode = #tpu.pipeline_mode<synchronous>, transform_indices = @transform_4, window_bounds = array<i64: 1, 64>}, {pipeline_mode = #tpu.pipeline_mode<synchronous>, transform_indices = @transform_5, window_bounds = array<i64: 32, 32>}, {pipeline_mode = #tpu.pipeline_mode<synchronous>, transform_indices = @transform_6, window_bounds = array<i64: 1, 32>}, {pipeline_mode = #tpu.pipeline_mode<synchronous>, transform_indices = @transform_7, window_bounds = array<i64: 32, 256>}, {pipeline_mode = #tpu.pipeline_mode<synchronous>, transform_indices = @transform_8, window_bounds = array<i64: 1, 256>}, {pipeline_mode = #tpu.pipeline_mode<synchronous>, transform_indices = @transform_9, window_bounds = array<i64: 64, 256>}, {pipeline_mode = #tpu.pipeline_mode<synchronous>, transform_indices = @transform_10, window_bounds = array<i64: 1, 256>}, {pipeline_mode = #tpu.pipeline_mode<synchronous>, transform_indices = @transform_11, window_bounds = array<i64: 256, 128>}, {pipeline_mode = #tpu.pipeline_mode<synchronous>, transform_indices = @transform_12, window_bounds = array<i64: 256, 128>}, {pipeline_mode = #tpu.pipeline_mode<synchronous>, transform_indices = @transform_13, window_bounds = array<i64: 1, 128>}, {transform_indices = @transform_14, window_bounds = array<i64: 8, 128>}, {transform_indices = @transform_15, window_bounds = array<i64: 8, 1>}]} {
    %c8_i32 = arith.constant 8 : i32
    %0 = arith.muli %arg0, %c8_i32 : i32
    %c0_i32 = arith.constant 0 : i32
    %1 = arith.addi %0, %c0_i32 : i32
    %2 = arith.index_cast %1 : i32 to index
    %3 = memref.load %arg1[%2] : memref<8xi32, #tpu.memory_space<smem>>
    %c0_i32_0 = arith.constant 0 : i32
    %c0_i32_1 = arith.constant 0 : i32
    %4 = tpu.memref_slice %arg4[%3, %c0_i32_1] : memref<100x32xf32, #tpu.memory_space<any>> -> memref<1x32xf32, #tpu.memory_space<any>>
    %c0_i32_2 = arith.constant 0 : i32
    %c0_i32_3 = arith.constant 0 : i32
    %5 = tpu.memref_slice %arg18[%c0_i32_2, %c0_i32_3] : memref<8x32xf32, #tpu.memory_space<vmem>> -> memref<1x32xf32, #tpu.memory_space<vmem>>
    %6 = tpu.memref_slice %arg19[%c0_i32_0] : memref<8x!tpu.dma_semaphore, #tpu.memory_space<semaphore_mem>> -> memref<1x!tpu.dma_semaphore, #tpu.memory_space<semaphore_mem>>
    %7 = tpu.memref_squeeze %6 : memref<1x!tpu.dma_semaphore, #tpu.memory_space<semaphore_mem>> -> memref<!tpu.dma_semaphore, #tpu.memory_space<semaphore_mem>>
    tpu.enqueue_dma source(%4 : memref<1x32xf32, #tpu.memory_space<any>>) target(%5 : memref<1x32xf32, #tpu.memory_space<vmem>>) target_semaphore(%7 : memref<!tpu.dma_semaphore, #tpu.memory_space<semaphore_mem>>)
    %c1_i32 = arith.constant 1 : i32
    %8 = arith.addi %0, %c1_i32 : i32
    %9 = arith.index_cast %8 : i32 to index
    %10 = memref.load %arg1[%9] : memref<8xi32, #tpu.memory_space<smem>>
    %c1_i32_4 = arith.constant 1 : i32
    %c0_i32_5 = arith.constant 0 : i32
    %11 = tpu.memref_slice %arg4[%10, %c0_i32_5] : memref<100x32xf32, #tpu.memory_space<any>> -> memref<1x32xf32, #tpu.memory_space<any>>
    %c1_i32_6 = arith.constant 1 : i32
    %c0_i32_7 = arith.constant 0 : i32
    %12 = tpu.memref_slice %arg18[%c1_i32_6, %c0_i32_7] : memref<8x32xf32, #tpu.memory_space<vmem>> -> memref<1x32xf32, #tpu.memory_space<vmem>>
    %13 = tpu.memref_slice %arg19[%c1_i32_4] : memref<8x!tpu.dma_semaphore, #tpu.memory_space<semaphore_mem>> -> memref<1x!tpu.dma_semaphore, #tpu.memory_space<semaphore_mem>>
    %14 = tpu.memref_squeeze %13 : memref<1x!tpu.dma_semaphore, #tpu.memory_space<semaphore_mem>> -> memref<!tpu.dma_semaphore, #tpu.memory_space<semaphore_mem>>
    tpu.enqueue_dma source(%11 : memref<1x32xf32, #tpu.memory_space<any>>) target(%12 : memref<1x32xf32, #tpu.memory_space<vmem>>) target_semaphore(%14 : memref<!tpu.dma_semaphore, #tpu.memory_space<semaphore_mem>>)
    %c2_i32 = arith.constant 2 : i32
    %15 = arith.addi %0, %c2_i32 : i32
    %16 = arith.index_cast %15 : i32 to index
    %17 = memref.load %arg1[%16] : memref<8xi32, #tpu.memory_space<smem>>
    %c2_i32_8 = arith.constant 2 : i32
    %c0_i32_9 = arith.constant 0 : i32
    %18 = tpu.memref_slice %arg4[%17, %c0_i32_9] : memref<100x32xf32, #tpu.memory_space<any>> -> memref<1x32xf32, #tpu.memory_space<any>>
    %c2_i32_10 = arith.constant 2 : i32
    %c0_i32_11 = arith.constant 0 : i32
    %19 = tpu.memref_slice %arg18[%c2_i32_10, %c0_i32_11] : memref<8x32xf32, #tpu.memory_space<vmem>> -> memref<1x32xf32, #tpu.memory_space<vmem>>
    %20 = tpu.memref_slice %arg19[%c2_i32_8] : memref<8x!tpu.dma_semaphore, #tpu.memory_space<semaphore_mem>> -> memref<1x!tpu.dma_semaphore, #tpu.memory_space<semaphore_mem>>
    %21 = tpu.memref_squeeze %20 : memref<1x!tpu.dma_semaphore, #tpu.memory_space<semaphore_mem>> -> memref<!tpu.dma_semaphore, #tpu.memory_space<semaphore_mem>>
    tpu.enqueue_dma source(%18 : memref<1x32xf32, #tpu.memory_space<any>>) target(%19 : memref<1x32xf32, #tpu.memory_space<vmem>>) target_semaphore(%21 : memref<!tpu.dma_semaphore, #tpu.memory_space<semaphore_mem>>)
    %c3_i32 = arith.constant 3 : i32
    %22 = arith.addi %0, %c3_i32 : i32
    %23 = arith.index_cast %22 : i32 to index
    %24 = memref.load %arg1[%23] : memref<8xi32, #tpu.memory_space<smem>>
    %c3_i32_12 = arith.constant 3 : i32
    %c0_i32_13 = arith.constant 0 : i32
    %25 = tpu.memref_slice %arg4[%24, %c0_i32_13] : memref<100x32xf32, #tpu.memory_space<any>> -> memref<1x32xf32, #tpu.memory_space<any>>
    %c3_i32_14 = arith.constant 3 : i32
    %c0_i32_15 = arith.constant 0 : i32
    %26 = tpu.memref_slice %arg18[%c3_i32_14, %c0_i32_15] : memref<8x32xf32, #tpu.memory_space<vmem>> -> memref<1x32xf32, #tpu.memory_space<vmem>>
    %27 = tpu.memref_slice %arg19[%c3_i32_12] : memref<8x!tpu.dma_semaphore, #tpu.memory_space<semaphore_mem>> -> memref<1x!tpu.dma_semaphore, #tpu.memory_space<semaphore_mem>>
    %28 = tpu.memref_squeeze %27 : memref<1x!tpu.dma_semaphore, #tpu.memory_space<semaphore_mem>> -> memref<!tpu.dma_semaphore, #tpu.memory_space<semaphore_mem>>
    tpu.enqueue_dma source(%25 : memref<1x32xf32, #tpu.memory_space<any>>) target(%26 : memref<1x32xf32, #tpu.memory_space<vmem>>) target_semaphore(%28 : memref<!tpu.dma_semaphore, #tpu.memory_space<semaphore_mem>>)
    %c4_i32 = arith.constant 4 : i32
    %29 = arith.addi %0, %c4_i32 : i32
    %30 = arith.index_cast %29 : i32 to index
    %31 = memref.load %arg1[%30] : memref<8xi32, #tpu.memory_space<smem>>
    %c4_i32_16 = arith.constant 4 : i32
    %c0_i32_17 = arith.constant 0 : i32
    %32 = tpu.memref_slice %arg4[%31, %c0_i32_17] : memref<100x32xf32, #tpu.memory_space<any>> -> memref<1x32xf32, #tpu.memory_space<any>>
    %c4_i32_18 = arith.constant 4 : i32
    %c0_i32_19 = arith.constant 0 : i32
    %33 = tpu.memref_slice %arg18[%c4_i32_18, %c0_i32_19] : memref<8x32xf32, #tpu.memory_space<vmem>> -> memref<1x32xf32, #tpu.memory_space<vmem>>
    %34 = tpu.memref_slice %arg19[%c4_i32_16] : memref<8x!tpu.dma_semaphore, #tpu.memory_space<semaphore_mem>> -> memref<1x!tpu.dma_semaphore, #tpu.memory_space<semaphore_mem>>
    %35 = tpu.memref_squeeze %34 : memref<1x!tpu.dma_semaphore, #tpu.memory_space<semaphore_mem>> -> memref<!tpu.dma_semaphore, #tpu.memory_space<semaphore_mem>>
    tpu.enqueue_dma source(%32 : memref<1x32xf32, #tpu.memory_space<any>>) target(%33 : memref<1x32xf32, #tpu.memory_space<vmem>>) target_semaphore(%35 : memref<!tpu.dma_semaphore, #tpu.memory_space<semaphore_mem>>)
    %c5_i32 = arith.constant 5 : i32
    %36 = arith.addi %0, %c5_i32 : i32
    %37 = arith.index_cast %36 : i32 to index
    %38 = memref.load %arg1[%37] : memref<8xi32, #tpu.memory_space<smem>>
    %c5_i32_20 = arith.constant 5 : i32
    %c0_i32_21 = arith.constant 0 : i32
    %39 = tpu.memref_slice %arg4[%38, %c0_i32_21] : memref<100x32xf32, #tpu.memory_space<any>> -> memref<1x32xf32, #tpu.memory_space<any>>
    %c5_i32_22 = arith.constant 5 : i32
    %c0_i32_23 = arith.constant 0 : i32
    %40 = tpu.memref_slice %arg18[%c5_i32_22, %c0_i32_23] : memref<8x32xf32, #tpu.memory_space<vmem>> -> memref<1x32xf32, #tpu.memory_space<vmem>>
    %41 = tpu.memref_slice %arg19[%c5_i32_20] : memref<8x!tpu.dma_semaphore, #tpu.memory_space<semaphore_mem>> -> memref<1x!tpu.dma_semaphore, #tpu.memory_space<semaphore_mem>>
    %42 = tpu.memref_squeeze %41 : memref<1x!tpu.dma_semaphore, #tpu.memory_space<semaphore_mem>> -> memref<!tpu.dma_semaphore, #tpu.memory_space<semaphore_mem>>
    tpu.enqueue_dma source(%39 : memref<1x32xf32, #tpu.memory_space<any>>) target(%40 : memref<1x32xf32, #tpu.memory_space<vmem>>) target_semaphore(%42 : memref<!tpu.dma_semaphore, #tpu.memory_space<semaphore_mem>>)
    %c6_i32 = arith.constant 6 : i32
    %43 = arith.addi %0, %c6_i32 : i32
    %44 = arith.index_cast %43 : i32 to index
    %45 = memref.load %arg1[%44] : memref<8xi32, #tpu.memory_space<smem>>
    %c6_i32_24 = arith.constant 6 : i32
    %c0_i32_25 = arith.constant 0 : i32
    %46 = tpu.memref_slice %arg4[%45, %c0_i32_25] : memref<100x32xf32, #tpu.memory_space<any>> -> memref<1x32xf32, #tpu.memory_space<any>>
    %c6_i32_26 = arith.constant 6 : i32
    %c0_i32_27 = arith.constant 0 : i32
    %47 = tpu.memref_slice %arg18[%c6_i32_26, %c0_i32_27] : memref<8x32xf32, #tpu.memory_space<vmem>> -> memref<1x32xf32, #tpu.memory_space<vmem>>
    %48 = tpu.memref_slice %arg19[%c6_i32_24] : memref<8x!tpu.dma_semaphore, #tpu.memory_space<semaphore_mem>> -> memref<1x!tpu.dma_semaphore, #tpu.memory_space<semaphore_mem>>
    %49 = tpu.memref_squeeze %48 : memref<1x!tpu.dma_semaphore, #tpu.memory_space<semaphore_mem>> -> memref<!tpu.dma_semaphore, #tpu.memory_space<semaphore_mem>>
    tpu.enqueue_dma source(%46 : memref<1x32xf32, #tpu.memory_space<any>>) target(%47 : memref<1x32xf32, #tpu.memory_space<vmem>>) target_semaphore(%49 : memref<!tpu.dma_semaphore, #tpu.memory_space<semaphore_mem>>)
    %c7_i32 = arith.constant 7 : i32
    %50 = arith.addi %0, %c7_i32 : i32
    %51 = arith.index_cast %50 : i32 to index
    %52 = memref.load %arg1[%51] : memref<8xi32, #tpu.memory_space<smem>>
    %c7_i32_28 = arith.constant 7 : i32
    %c0_i32_29 = arith.constant 0 : i32
    %53 = tpu.memref_slice %arg4[%52, %c0_i32_29] : memref<100x32xf32, #tpu.memory_space<any>> -> memref<1x32xf32, #tpu.memory_space<any>>
    %c7_i32_30 = arith.constant 7 : i32
    %c0_i32_31 = arith.constant 0 : i32
    %54 = tpu.memref_slice %arg18[%c7_i32_30, %c0_i32_31] : memref<8x32xf32, #tpu.memory_space<vmem>> -> memref<1x32xf32, #tpu.memory_space<vmem>>
    %55 = tpu.memref_slice %arg19[%c7_i32_28] : memref<8x!tpu.dma_semaphore, #tpu.memory_space<semaphore_mem>> -> memref<1x!tpu.dma_semaphore, #tpu.memory_space<semaphore_mem>>
    %56 = tpu.memref_squeeze %55 : memref<1x!tpu.dma_semaphore, #tpu.memory_space<semaphore_mem>> -> memref<!tpu.dma_semaphore, #tpu.memory_space<semaphore_mem>>
    tpu.enqueue_dma source(%53 : memref<1x32xf32, #tpu.memory_space<any>>) target(%54 : memref<1x32xf32, #tpu.memory_space<vmem>>) target_semaphore(%56 : memref<!tpu.dma_semaphore, #tpu.memory_space<semaphore_mem>>)
    %c0_i32_32 = arith.constant 0 : i32
    %c0_i32_33 = arith.constant 0 : i32
    %c0_i32_34 = arith.constant 0 : i32
    %57 = tpu.memref_slice %arg4[%c0_i32_33, %c0_i32_34] : memref<100x32xf32, #tpu.memory_space<any>> -> memref<1x32xf32, #tpu.memory_space<any>>
    %c0_i32_35 = arith.constant 0 : i32
    %c0_i32_36 = arith.constant 0 : i32
    %58 = tpu.memref_slice %arg18[%c0_i32_35, %c0_i32_36] : memref<8x32xf32, #tpu.memory_space<vmem>> -> memref<1x32xf32, #tpu.memory_space<vmem>>
    %59 = tpu.memref_slice %arg19[%c0_i32_32] : memref<8x!tpu.dma_semaphore, #tpu.memory_space<semaphore_mem>> -> memref<1x!tpu.dma_semaphore, #tpu.memory_space<semaphore_mem>>
    %60 = tpu.memref_squeeze %59 : memref<1x!tpu.dma_semaphore, #tpu.memory_space<semaphore_mem>> -> memref<!tpu.dma_semaphore, #tpu.memory_space<semaphore_mem>>
    tpu.wait_dma2 semaphore(%60 : memref<!tpu.dma_semaphore, #tpu.memory_space<semaphore_mem>>) src(%57 : memref<1x32xf32, #tpu.memory_space<any>>) dst(%58 : memref<1x32xf32, #tpu.memory_space<vmem>>)
    %c1_i32_37 = arith.constant 1 : i32
    %c0_i32_38 = arith.constant 0 : i32
    %c0_i32_39 = arith.constant 0 : i32
    %61 = tpu.memref_slice %arg4[%c0_i32_38, %c0_i32_39] : memref<100x32xf32, #tpu.memory_space<any>> -> memref<1x32xf32, #tpu.memory_space<any>>
    %c1_i32_40 = arith.constant 1 : i32
    %c0_i32_41 = arith.constant 0 : i32
    %62 = tpu.memref_slice %arg18[%c1_i32_40, %c0_i32_41] : memref<8x32xf32, #tpu.memory_space<vmem>> -> memref<1x32xf32, #tpu.memory_space<vmem>>
    %63 = tpu.memref_slice %arg19[%c1_i32_37] : memref<8x!tpu.dma_semaphore, #tpu.memory_space<semaphore_mem>> -> memref<1x!tpu.dma_semaphore, #tpu.memory_space<semaphore_mem>>
    %64 = tpu.memref_squeeze %63 : memref<1x!tpu.dma_semaphore, #tpu.memory_space<semaphore_mem>> -> memref<!tpu.dma_semaphore, #tpu.memory_space<semaphore_mem>>
    tpu.wait_dma2 semaphore(%64 : memref<!tpu.dma_semaphore, #tpu.memory_space<semaphore_mem>>) src(%61 : memref<1x32xf32, #tpu.memory_space<any>>) dst(%62 : memref<1x32xf32, #tpu.memory_space<vmem>>)
    %c2_i32_42 = arith.constant 2 : i32
    %c0_i32_43 = arith.constant 0 : i32
    %c0_i32_44 = arith.constant 0 : i32
    %65 = tpu.memref_slice %arg4[%c0_i32_43, %c0_i32_44] : memref<100x32xf32, #tpu.memory_space<any>> -> memref<1x32xf32, #tpu.memory_space<any>>
    %c2_i32_45 = arith.constant 2 : i32
    %c0_i32_46 = arith.constant 0 : i32
    %66 = tpu.memref_slice %arg18[%c2_i32_45, %c0_i32_46] : memref<8x32xf32, #tpu.memory_space<vmem>> -> memref<1x32xf32, #tpu.memory_space<vmem>>
    %67 = tpu.memref_slice %arg19[%c2_i32_42] : memref<8x!tpu.dma_semaphore, #tpu.memory_space<semaphore_mem>> -> memref<1x!tpu.dma_semaphore, #tpu.memory_space<semaphore_mem>>
    %68 = tpu.memref_squeeze %67 : memref<1x!tpu.dma_semaphore, #tpu.memory_space<semaphore_mem>> -> memref<!tpu.dma_semaphore, #tpu.memory_space<semaphore_mem>>
    tpu.wait_dma2 semaphore(%68 : memref<!tpu.dma_semaphore, #tpu.memory_space<semaphore_mem>>) src(%65 : memref<1x32xf32, #tpu.memory_space<any>>) dst(%66 : memref<1x32xf32, #tpu.memory_space<vmem>>)
    %c3_i32_47 = arith.constant 3 : i32
    %c0_i32_48 = arith.constant 0 : i32
    %c0_i32_49 = arith.constant 0 : i32
    %69 = tpu.memref_slice %arg4[%c0_i32_48, %c0_i32_49] : memref<100x32xf32, #tpu.memory_space<any>> -> memref<1x32xf32, #tpu.memory_space<any>>
    %c3_i32_50 = arith.constant 3 : i32
    %c0_i32_51 = arith.constant 0 : i32
    %70 = tpu.memref_slice %arg18[%c3_i32_50, %c0_i32_51] : memref<8x32xf32, #tpu.memory_space<vmem>> -> memref<1x32xf32, #tpu.memory_space<vmem>>
    %71 = tpu.memref_slice %arg19[%c3_i32_47] : memref<8x!tpu.dma_semaphore, #tpu.memory_space<semaphore_mem>> -> memref<1x!tpu.dma_semaphore, #tpu.memory_space<semaphore_mem>>
    %72 = tpu.memref_squeeze %71 : memref<1x!tpu.dma_semaphore, #tpu.memory_space<semaphore_mem>> -> memref<!tpu.dma_semaphore, #tpu.memory_space<semaphore_mem>>
    tpu.wait_dma2 semaphore(%72 : memref<!tpu.dma_semaphore, #tpu.memory_space<semaphore_mem>>) src(%69 : memref<1x32xf32, #tpu.memory_space<any>>) dst(%70 : memref<1x32xf32, #tpu.memory_space<vmem>>)
    %c4_i32_52 = arith.constant 4 : i32
    %c0_i32_53 = arith.constant 0 : i32
    %c0_i32_54 = arith.constant 0 : i32
    %73 = tpu.memref_slice %arg4[%c0_i32_53, %c0_i32_54] : memref<100x32xf32, #tpu.memory_space<any>> -> memref<1x32xf32, #tpu.memory_space<any>>
    %c4_i32_55 = arith.constant 4 : i32
    %c0_i32_56 = arith.constant 0 : i32
    %74 = tpu.memref_slice %arg18[%c4_i32_55, %c0_i32_56] : memref<8x32xf32, #tpu.memory_space<vmem>> -> memref<1x32xf32, #tpu.memory_space<vmem>>
    %75 = tpu.memref_slice %arg19[%c4_i32_52] : memref<8x!tpu.dma_semaphore, #tpu.memory_space<semaphore_mem>> -> memref<1x!tpu.dma_semaphore, #tpu.memory_space<semaphore_mem>>
    %76 = tpu.memref_squeeze %75 : memref<1x!tpu.dma_semaphore, #tpu.memory_space<semaphore_mem>> -> memref<!tpu.dma_semaphore, #tpu.memory_space<semaphore_mem>>
    tpu.wait_dma2 semaphore(%76 : memref<!tpu.dma_semaphore, #tpu.memory_space<semaphore_mem>>) src(%73 : memref<1x32xf32, #tpu.memory_space<any>>) dst(%74 : memref<1x32xf32, #tpu.memory_space<vmem>>)
    %c5_i32_57 = arith.constant 5 : i32
    %c0_i32_58 = arith.constant 0 : i32
    %c0_i32_59 = arith.constant 0 : i32
    %77 = tpu.memref_slice %arg4[%c0_i32_58, %c0_i32_59] : memref<100x32xf32, #tpu.memory_space<any>> -> memref<1x32xf32, #tpu.memory_space<any>>
    %c5_i32_60 = arith.constant 5 : i32
    %c0_i32_61 = arith.constant 0 : i32
    %78 = tpu.memref_slice %arg18[%c5_i32_60, %c0_i32_61] : memref<8x32xf32, #tpu.memory_space<vmem>> -> memref<1x32xf32, #tpu.memory_space<vmem>>
    %79 = tpu.memref_slice %arg19[%c5_i32_57] : memref<8x!tpu.dma_semaphore, #tpu.memory_space<semaphore_mem>> -> memref<1x!tpu.dma_semaphore, #tpu.memory_space<semaphore_mem>>
    %80 = tpu.memref_squeeze %79 : memref<1x!tpu.dma_semaphore, #tpu.memory_space<semaphore_mem>> -> memref<!tpu.dma_semaphore, #tpu.memory_space<semaphore_mem>>
    tpu.wait_dma2 semaphore(%80 : memref<!tpu.dma_semaphore, #tpu.memory_space<semaphore_mem>>) src(%77 : memref<1x32xf32, #tpu.memory_space<any>>) dst(%78 : memref<1x32xf32, #tpu.memory_space<vmem>>)
    %c6_i32_62 = arith.constant 6 : i32
    %c0_i32_63 = arith.constant 0 : i32
    %c0_i32_64 = arith.constant 0 : i32
    %81 = tpu.memref_slice %arg4[%c0_i32_63, %c0_i32_64] : memref<100x32xf32, #tpu.memory_space<any>> -> memref<1x32xf32, #tpu.memory_space<any>>
    %c6_i32_65 = arith.constant 6 : i32
    %c0_i32_66 = arith.constant 0 : i32
    %82 = tpu.memref_slice %arg18[%c6_i32_65, %c0_i32_66] : memref<8x32xf32, #tpu.memory_space<vmem>> -> memref<1x32xf32, #tpu.memory_space<vmem>>
    %83 = tpu.memref_slice %arg19[%c6_i32_62] : memref<8x!tpu.dma_semaphore, #tpu.memory_space<semaphore_mem>> -> memref<1x!tpu.dma_semaphore, #tpu.memory_space<semaphore_mem>>
    %84 = tpu.memref_squeeze %83 : memref<1x!tpu.dma_semaphore, #tpu.memory_space<semaphore_mem>> -> memref<!tpu.dma_semaphore, #tpu.memory_space<semaphore_mem>>
    tpu.wait_dma2 semaphore(%84 : memref<!tpu.dma_semaphore, #tpu.memory_space<semaphore_mem>>) src(%81 : memref<1x32xf32, #tpu.memory_space<any>>) dst(%82 : memref<1x32xf32, #tpu.memory_space<vmem>>)
    %c7_i32_67 = arith.constant 7 : i32
    %c0_i32_68 = arith.constant 0 : i32
    %c0_i32_69 = arith.constant 0 : i32
    %85 = tpu.memref_slice %arg4[%c0_i32_68, %c0_i32_69] : memref<100x32xf32, #tpu.memory_space<any>> -> memref<1x32xf32, #tpu.memory_space<any>>
    %c7_i32_70 = arith.constant 7 : i32
    %c0_i32_71 = arith.constant 0 : i32
    %86 = tpu.memref_slice %arg18[%c7_i32_70, %c0_i32_71] : memref<8x32xf32, #tpu.memory_space<vmem>> -> memref<1x32xf32, #tpu.memory_space<vmem>>
    %87 = tpu.memref_slice %arg19[%c7_i32_67] : memref<8x!tpu.dma_semaphore, #tpu.memory_space<semaphore_mem>> -> memref<1x!tpu.dma_semaphore, #tpu.memory_space<semaphore_mem>>
    %88 = tpu.memref_squeeze %87 : memref<1x!tpu.dma_semaphore, #tpu.memory_space<semaphore_mem>> -> memref<!tpu.dma_semaphore, #tpu.memory_space<semaphore_mem>>
    tpu.wait_dma2 semaphore(%88 : memref<!tpu.dma_semaphore, #tpu.memory_space<semaphore_mem>>) src(%85 : memref<1x32xf32, #tpu.memory_space<any>>) dst(%86 : memref<1x32xf32, #tpu.memory_space<vmem>>)
    %c0 = arith.constant 0 : index
    %c0_72 = arith.constant 0 : index
    %89 = vector.load %arg2[%c0, %c0_72] : memref<8x3xf32, #tpu.memory_space<vmem>>, vector<8x3xf32>
    %90 = arith.truncf %89 : vector<8x3xf32> to vector<8x3xbf16>
    %c0_73 = arith.constant 0 : index
    %c0_74 = arith.constant 0 : index
    %91 = vector.load %arg5[%c0_73, %c0_74] : memref<3x64xbf16, #tpu.memory_space<vmem>>, vector<3x64xbf16>
    %cst = arith.constant dense<0.000000e+00> : vector<8x64xf32>
    %92 = tpu.matmul %90, %91, %cst {dimension_numbers = #tpu.dot_dimension_numbers<[1], [0], [0], [1], [0, 0, 1, 1], [], []>} : vector<8x3xbf16>, vector<3x64xbf16>, vector<8x64xf32> -> vector<8x64xf32>
    %c0_75 = arith.constant 0 : index
    %c0_76 = arith.constant 0 : index
    %93 = vector.load %arg6[%c0_75, %c0_76] : memref<1x64xf32, #tpu.memory_space<vmem>>, vector<1x64xf32>
    %94 = vector.broadcast %93 : vector<1x64xf32> to vector<8x64xf32>
    %95 = arith.addf %92, %94 : vector<8x64xf32>
    %c0_77 = arith.constant 0 : index
    %c0_78 = arith.constant 0 : index
    %96 = vector.load %arg18[%c0_77, %c0_78] : memref<8x32xf32, #tpu.memory_space<vmem>>, vector<8x32xf32>
    %97 = arith.truncf %96 : vector<8x32xf32> to vector<8x32xbf16>
    %c0_79 = arith.constant 0 : index
    %c0_80 = arith.constant 0 : index
    %98 = vector.load %arg7[%c0_79, %c0_80] : memref<32x32xbf16, #tpu.memory_space<vmem>>, vector<32x32xbf16>
    %cst_81 = arith.constant dense<0.000000e+00> : vector<8x32xf32>
    %99 = tpu.matmul %97, %98, %cst_81 {dimension_numbers = #tpu.dot_dimension_numbers<[1], [0], [0], [1], [0, 0, 1, 1], [], []>} : vector<8x32xbf16>, vector<32x32xbf16>, vector<8x32xf32> -> vector<8x32xf32>
    %c0_82 = arith.constant 0 : index
    %c0_83 = arith.constant 0 : index
    %100 = vector.load %arg8[%c0_82, %c0_83] : memref<1x32xf32, #tpu.memory_space<vmem>>, vector<1x32xf32>
    %101 = vector.broadcast %100 : vector<1x32xf32> to vector<8x32xf32>
    %102 = arith.addf %99, %101 : vector<8x32xf32>
    %cst_84 = arith.constant 0.000000e+00 : f32
    %103 = vector.broadcast %cst_84 : f32 to vector<8x32xf32>
    %104 = arith.maximumf %102, %103 : vector<8x32xf32>
    %105 = arith.truncf %104 : vector<8x32xf32> to vector<8x32xbf16>
    %c0_85 = arith.constant 0 : index
    %c0_86 = arith.constant 0 : index
    %106 = vector.load %arg9[%c0_85, %c0_86] : memref<32x256xbf16, #tpu.memory_space<vmem>>, vector<32x256xbf16>
    %cst_87 = arith.constant dense<0.000000e+00> : vector<8x256xf32>
    %107 = tpu.matmul %105, %106, %cst_87 {dimension_numbers = #tpu.dot_dimension_numbers<[1], [0], [0], [1], [0, 0, 1, 1], [], []>} : vector<8x32xbf16>, vector<32x256xbf16>, vector<8x256xf32> -> vector<8x256xf32>
    %c0_88 = arith.constant 0 : index
    %c0_89 = arith.constant 0 : index
    %108 = vector.load %arg10[%c0_88, %c0_89] : memref<1x256xf32, #tpu.memory_space<vmem>>, vector<1x256xf32>
    %109 = vector.broadcast %108 : vector<1x256xf32> to vector<8x256xf32>
    %110 = arith.addf %107, %109 : vector<8x256xf32>
    %111 = arith.truncf %95 : vector<8x64xf32> to vector<8x64xbf16>
    %c0_90 = arith.constant 0 : index
    %c0_91 = arith.constant 0 : index
    %112 = vector.load %arg11[%c0_90, %c0_91] : memref<64x256xbf16, #tpu.memory_space<vmem>>, vector<64x256xbf16>
    %cst_92 = arith.constant dense<0.000000e+00> : vector<8x256xf32>
    %113 = tpu.matmul %111, %112, %cst_92 {dimension_numbers = #tpu.dot_dimension_numbers<[1], [0], [0], [1], [0, 0, 1, 1], [], []>} : vector<8x64xbf16>, vector<64x256xbf16>, vector<8x256xf32> -> vector<8x256xf32>
    %c0_93 = arith.constant 0 : index
    %c0_94 = arith.constant 0 : index
    %114 = vector.load %arg12[%c0_93, %c0_94] : memref<1x256xf32, #tpu.memory_space<vmem>>, vector<1x256xf32>
    %115 = vector.broadcast %114 : vector<1x256xf32> to vector<8x256xf32>
    %116 = arith.addf %113, %115 : vector<8x256xf32>
    %117 = arith.mulf %110, %110 : vector<8x256xf32>
    %cst_95 = arith.constant dense<0.000000e+00> : vector<8xf32>
    %118 = vector.multi_reduction <add>, %117, %cst_95 [1] : vector<8x256xf32> to vector<8xf32>
    %119 = vector.shape_cast %118 : vector<8xf32> to vector<8x1xf32>
    %120 = math.rsqrt %119 : vector<8x1xf32>
    %121 = vector.broadcast %120 : vector<8x1xf32> to vector<8x256xf32>
    %122 = arith.mulf %110, %121 : vector<8x256xf32>
    %123 = arith.mulf %116, %116 : vector<8x256xf32>
    %cst_96 = arith.constant dense<0.000000e+00> : vector<8xf32>
    %124 = vector.multi_reduction <add>, %123, %cst_96 [1] : vector<8x256xf32> to vector<8xf32>
    %125 = vector.shape_cast %124 : vector<8xf32> to vector<8x1xf32>
    %126 = math.rsqrt %125 : vector<8x1xf32>
    %127 = vector.broadcast %126 : vector<8x1xf32> to vector<8x256xf32>
    %128 = arith.mulf %116, %127 : vector<8x256xf32>
    %129 = arith.truncf %122 : vector<8x256xf32> to vector<8x256xbf16>
    %c0_97 = arith.constant 0 : index
    %c0_98 = arith.constant 0 : index
    %130 = vector.load %arg13[%c0_97, %c0_98] : memref<256x128xbf16, #tpu.memory_space<vmem>>, vector<256x128xbf16>
    %cst_99 = arith.constant dense<0.000000e+00> : vector<8x128xf32>
    %131 = tpu.matmul %129, %130, %cst_99 {dimension_numbers = #tpu.dot_dimension_numbers<[1], [0], [0], [1], [0, 0, 1, 1], [], []>} : vector<8x256xbf16>, vector<256x128xbf16>, vector<8x128xf32> -> vector<8x128xf32>
    %132 = arith.truncf %128 : vector<8x256xf32> to vector<8x256xbf16>
    %c0_100 = arith.constant 0 : index
    %c0_101 = arith.constant 0 : index
    %133 = vector.load %arg14[%c0_100, %c0_101] : memref<256x128xbf16, #tpu.memory_space<vmem>>, vector<256x128xbf16>
    %cst_102 = arith.constant dense<0.000000e+00> : vector<8x128xf32>
    %134 = tpu.matmul %132, %133, %cst_102 {dimension_numbers = #tpu.dot_dimension_numbers<[1], [0], [0], [1], [0, 0, 1, 1], [], []>} : vector<8x256xbf16>, vector<256x128xbf16>, vector<8x128xf32> -> vector<8x128xf32>
    %135 = arith.addf %131, %134 : vector<8x128xf32>
    %c0_103 = arith.constant 0 : index
    %c0_104 = arith.constant 0 : index
    %136 = vector.load %arg15[%c0_103, %c0_104] : memref<1x128xf32, #tpu.memory_space<vmem>>, vector<1x128xf32>
    %137 = vector.broadcast %136 : vector<1x128xf32> to vector<8x128xf32>
    %138 = arith.addf %135, %137 : vector<8x128xf32>
    %c0_105 = arith.constant 0 : index
    %c0_106 = arith.constant 0 : index
    %139 = vector.load %arg16[%c0_105, %c0_106] : memref<8x128xf32, #tpu.memory_space<vmem>>, vector<8x128xf32>
    tpu.vector_store %arg16[%c0_105, %c0_106], %138 {strides = array<i32>} : memref<8x128xf32, #tpu.memory_space<vmem>>, vector<8x128xf32>,
    %cst_107 = arith.constant dense<0xFF800000> : vector<8xf32>
    %140 = vector.multi_reduction <maximumf>, %138, %cst_107 [1] : vector<8x128xf32> to vector<8xf32>
    %141 = vector.shape_cast %140 : vector<8xf32> to vector<8x1xf32>
    %142 = vector.broadcast %141 : vector<8x1xf32> to vector<8x128xf32>
    %143 = arith.subf %138, %142 : vector<8x128xf32>
    %144 = math.exp %143 : vector<8x128xf32>
    %cst_108 = arith.constant dense<0.000000e+00> : vector<8xf32>
    %145 = vector.multi_reduction <add>, %144, %cst_108 [1] : vector<8x128xf32> to vector<8xf32>
    %146 = vector.shape_cast %145 : vector<8xf32> to vector<8x1xf32>
    %147 = math.log %146 : vector<8x1xf32>
    %148 = arith.addf %147, %141 : vector<8x1xf32>
    %149 = tpu.iota {dimensions = array<i32: 1>} : vector<8x128xi32>
    %c0_109 = arith.constant 0 : index
    %c0_110 = arith.constant 0 : index
    %150 = vector.load %arg3[%c0_109, %c0_110] : memref<8x1xi32, #tpu.memory_space<vmem>>, vector<8x1xi32>
    %151 = vector.broadcast %150 : vector<8x1xi32> to vector<8x128xi32>
    %152 = arith.cmpi eq, %149, %151 : vector<8x128xi32>
    %cst_111 = arith.constant 1.000000e+00 : f32
    %cst_112 = arith.constant 0.000000e+00 : f32
    %153 = vector.broadcast %cst_111 : f32 to vector<8x128xf32>
    %154 = vector.broadcast %cst_112 : f32 to vector<8x128xf32>
    %155 = arith.select %152, %153, %154 : vector<8x128xi1>, vector<8x128xf32>
    %156 = arith.mulf %138, %155 : vector<8x128xf32>
    %cst_113 = arith.constant dense<0.000000e+00> : vector<8xf32>
    %157 = vector.multi_reduction <add>, %156, %cst_113 [1] : vector<8x128xf32> to vector<8xf32>
    %158 = vector.shape_cast %157 : vector<8xf32> to vector<8x1xf32>
    %159 = tpu.iota {dimensions = array<i32: 0>} : vector<8x1xi32>
    %160 = vector.broadcast %0 : i32 to vector<8x1xi32>
    %161 = arith.addi %160, %159 : vector<8x1xi32>
    %c2_i32_114 = arith.constant 2 : i32
    %162 = vector.broadcast %c2_i32_114 : i32 to vector<8x1xi32>
    %163 = arith.cmpi slt, %161, %162 : vector<8x1xi32>
    %164 = arith.subf %148, %158 : vector<8x1xf32>
    %cst_115 = arith.constant 0.000000e+00 : f32
    %165 = vector.broadcast %cst_115 : f32 to vector<8x1xf32>
    %166 = arith.select %163, %164, %165 : vector<8x1xi1>, vector<8x1xf32>
    %c0_116 = arith.constant 0 : index
    %c0_117 = arith.constant 0 : index
    %167 = vector.load %arg17[%c0_116, %c0_117] : memref<8x1xf32, #tpu.memory_space<vmem>>, vector<8x1xf32>
    tpu.vector_store %arg17[%c0_116, %c0_117], %166 {strides = array<i32>} : memref<8x1xf32, #tpu.memory_space<vmem>>, vector<8x1xf32>,
    return
  }
  func.func @transform_0(%arg0: i32, %arg1: memref<8xi32, #tpu.memory_space<smem>>) -> (i32, i32) {
    %c0_i32 = arith.constant 0 : i32
    %c0_i32_0 = arith.constant 0 : i32
    return %arg0, %c0_i32 : i32, i32
  }
  func.func @transform_1(%arg0: i32, %arg1: memref<8xi32, #tpu.memory_space<smem>>) -> (i32, i32) {
    %c0_i32 = arith.constant 0 : i32
    %c0_i32_0 = arith.constant 0 : i32
    return %arg0, %c0_i32 : i32, i32
  }
  func.func @transform_3(%arg0: i32, %arg1: memref<8xi32, #tpu.memory_space<smem>>) -> (i32, i32) {
    %c0_i32 = arith.constant 0 : i32
    %c0_i32_0 = arith.constant 0 : i32
    %c0_i32_1 = arith.constant 0 : i32
    return %c0_i32, %c0_i32_0 : i32, i32
  }
  func.func @transform_4(%arg0: i32, %arg1: memref<8xi32, #tpu.memory_space<smem>>) -> (i32, i32) {
    %c0_i32 = arith.constant 0 : i32
    %c0_i32_0 = arith.constant 0 : i32
    %c0_i32_1 = arith.constant 0 : i32
    return %c0_i32, %c0_i32_0 : i32, i32
  }
  func.func @transform_5(%arg0: i32, %arg1: memref<8xi32, #tpu.memory_space<smem>>) -> (i32, i32) {
    %c0_i32 = arith.constant 0 : i32
    %c0_i32_0 = arith.constant 0 : i32
    %c0_i32_1 = arith.constant 0 : i32
    return %c0_i32, %c0_i32_0 : i32, i32
  }
  func.func @transform_6(%arg0: i32, %arg1: memref<8xi32, #tpu.memory_space<smem>>) -> (i32, i32) {
    %c0_i32 = arith.constant 0 : i32
    %c0_i32_0 = arith.constant 0 : i32
    %c0_i32_1 = arith.constant 0 : i32
    return %c0_i32, %c0_i32_0 : i32, i32
  }
  func.func @transform_7(%arg0: i32, %arg1: memref<8xi32, #tpu.memory_space<smem>>) -> (i32, i32) {
    %c0_i32 = arith.constant 0 : i32
    %c0_i32_0 = arith.constant 0 : i32
    %c0_i32_1 = arith.constant 0 : i32
    return %c0_i32, %c0_i32_0 : i32, i32
  }
  func.func @transform_8(%arg0: i32, %arg1: memref<8xi32, #tpu.memory_space<smem>>) -> (i32, i32) {
    %c0_i32 = arith.constant 0 : i32
    %c0_i32_0 = arith.constant 0 : i32
    %c0_i32_1 = arith.constant 0 : i32
    return %c0_i32, %c0_i32_0 : i32, i32
  }
  func.func @transform_9(%arg0: i32, %arg1: memref<8xi32, #tpu.memory_space<smem>>) -> (i32, i32) {
    %c0_i32 = arith.constant 0 : i32
    %c0_i32_0 = arith.constant 0 : i32
    %c0_i32_1 = arith.constant 0 : i32
    return %c0_i32, %c0_i32_0 : i32, i32
  }
  func.func @transform_10(%arg0: i32, %arg1: memref<8xi32, #tpu.memory_space<smem>>) -> (i32, i32) {
    %c0_i32 = arith.constant 0 : i32
    %c0_i32_0 = arith.constant 0 : i32
    %c0_i32_1 = arith.constant 0 : i32
    return %c0_i32, %c0_i32_0 : i32, i32
  }
  func.func @transform_11(%arg0: i32, %arg1: memref<8xi32, #tpu.memory_space<smem>>) -> (i32, i32) {
    %c0_i32 = arith.constant 0 : i32
    %c0_i32_0 = arith.constant 0 : i32
    %c0_i32_1 = arith.constant 0 : i32
    return %c0_i32, %c0_i32_0 : i32, i32
  }
  func.func @transform_12(%arg0: i32, %arg1: memref<8xi32, #tpu.memory_space<smem>>) -> (i32, i32) {
    %c0_i32 = arith.constant 0 : i32
    %c0_i32_0 = arith.constant 0 : i32
    %c0_i32_1 = arith.constant 0 : i32
    return %c0_i32, %c0_i32_0 : i32, i32
  }
  func.func @transform_13(%arg0: i32, %arg1: memref<8xi32, #tpu.memory_space<smem>>) -> (i32, i32) {
    %c0_i32 = arith.constant 0 : i32
    %c0_i32_0 = arith.constant 0 : i32
    %c0_i32_1 = arith.constant 0 : i32
    return %c0_i32, %c0_i32_0 : i32, i32
  }
  func.func @transform_14(%arg0: i32, %arg1: memref<8xi32, #tpu.memory_space<smem>>) -> (i32, i32) {
    %c0_i32 = arith.constant 0 : i32
    %c0_i32_0 = arith.constant 0 : i32
    return %arg0, %c0_i32 : i32, i32
  }
  func.func @transform_15(%arg0: i32, %arg1: memref<8xi32, #tpu.memory_space<smem>>) -> (i32, i32) {
    %c0_i32 = arith.constant 0 : i32
    %c0_i32_0 = arith.constant 0 : i32
    return %arg0, %c0_i32 : i32, i32
  }
}

</mosaic_0001>

<bundles_post_ra>
// kernel: forward.1
= control target key start
LH: loop header
LB: loop body
LE: loop exit
PB: predicated region body
PF: predicated region fallthrough
CT: control target
= control target key end

     0   :  { %s2119_s0 = inlined_call_operand.vmem [shape: s32[8], index: 0, kind: input, shape index: {}]   ;;  %s2120_s1 = inlined_call_operand.vmem [shape: f32[8,3], index: 1, kind: input, shape index: {}]   ;;  %s2121_s2 = inlined_call_operand.vmem [shape: s32[8,1], index: 2, kind: input, shape index: {}]   ;;  %s2122_s3 = inlined_call_operand.vmem [shape: f32[100,32], index: 3, kind: input, shape index: {}]   ;;  %s2123_s4 = inlined_call_operand.vmem [shape: bf16[3,64], index: 4, kind: input, shape index: {}]   ;;  %s2124_s5 = inlined_call_operand.hbm [shape: f32[1,64], index: 5, kind: input, shape index: {}]   ;;  %s2125_s6 = inlined_call_operand.hbm [shape: bf16[32,32], index: 6, kind: input, shape index: {}]   ;;  %s2126_s7 = inlined_call_operand.hbm [shape: f32[1,32], index: 7, kind: input, shape index: {}]   ;;  %s2127_s8 = inlined_call_operand.vmem [shape: bf16[32,256], index: 8, kind: input, shape index: {}]   ;;  %s2128_s9 = inlined_call_operand.hbm [shape: f32[1,256], index: 9, kind: input, shape index: {}]   ;;  %s2129_s10 = inlined_call_operand.hbm [shape: bf16[64,256], index: 10, kind: input, shape index: {}]   ;;  %s2130_s11 = inlined_call_operand.hbm [shape: f32[1,256], index: 11, kind: input, shape index: {}]   ;;  %s2131_s12 = inlined_call_operand.vmem [shape: bf16[256,128], index: 12, kind: input, shape index: {}]   ;;  %s2132_s13 = inlined_call_operand.vmem [shape: bf16[256,128], index: 13, kind: input, shape index: {}]   ;;  %s2133_s14 = inlined_call_operand.hbm [shape: f32[1,128], index: 14, kind: input, shape index: {}]   ;;  %s2134_s15 = inlined_call_operand.vmem [shape: f32[8,128], index: 15, kind: output, shape index: {0}]   ;;  %s2135_s16 = inlined_call_operand.vmem [shape: f32[8,1], index: 16, kind: output, shape index: {1}]  }
   0x1   :  { %2136 = sst [smem:[#allocation38_spill]] %s2119_s0 }
   0x2   :  { %2137 = sst [smem:[#allocation39_spill]] %s2121_s2 }
   0x3   :  { %s2138_s23 = sld [smem:[#allocation38_spill]] }
   0x9   :  { %s22_s2 = sshll.u32 %s2138_s23, 4  ;;  %s23_s2 = int_to_ptr.vmem [resolvable:$true] %s22_s2 }
   0xa   :  { %s1647_s24 = scalar_lea.vmem %s23_s2, 16  ;;  %p1652_p1 = scmp.lt.s32.totalorder %s23_s2, %s23_s2 }
   0xb   :  { %p1648_p0 = scmp.ne.s32.totalorder %s23_s2, %s1647_s24  ;;  %p1653_p2 = scmp.lt.s32.totalorder %s1647_s24, %s1647_s24 }
   0xd   :  { %p1654_p3 = por %p1653_p2, %p1652_p1 }
   0xf   :  { %p1655_p4 = pnand %p1654_p3, %p1648_p0 }
  0x11   :  { %1658 = shalt.err (!%p1655_p4)  }
  0x12   :  { %s1825_s25 = smov [#allocation5]  }
  0x13   :  { %25 = dma.vmem_to_smem %s23_s2, 16, %s1825_s25, [#allocation4] }
  0x14   :  { %1799 = dma.done.wait [#allocation4], 16 }
  0x15   :  { %1800 = vsyncadd [#allocation4], 4294967280 }
  0x16   :  { %27 = sfence }
  0x17   :  { %28 = vsyncpa [#allocation7], 0 }
  0x18   :  { %29 = vsyncpa [#allocation9], 0 }
  0x19   :  { %30 = vsyncpa [#allocation12], 0 }
  0x1a   :  { %31 = vsyncpa [#allocation15], 0  ;;  %s1826_s26 = smov [#allocation8]  }
  0x1b   :  { %s53_s27 = sshll.u32 %s1826_s26, 4  ;;  %s54_s27 = int_to_ptr.vmem [resolvable:$true] %s53_s27 }
  0x1c   :  { %s1667_s28 = scalar_lea.vmem %s54_s27, 256  ;;  %p1672_p6 = scmp.lt.s32.totalorder %s54_s27, %s54_s27 }
  0x1d   :  { %p1668_p5 = scmp.ne.s32.totalorder %s54_s27, %s1667_s28  ;;  %p1673_p7 = scmp.lt.s32.totalorder %s1667_s28, %s1667_s28 }
  0x1f   :  { %p1674_p8 = por %p1673_p7, %p1672_p6 }
  0x21   :  { %p1675_p9 = pnand %p1674_p8, %p1668_p5 }
  0x23   :  { %1678 = shalt.err (!%p1675_p9)
}
  0x24   :  { %s1827_s29 = smov 64   ;;  %s1828_s30 = smov 4  }
  0x25   :  { %59 = dma.hbm_to_vmem [thread:$0]  %s2125_s6, 256, %s54_s27, [#allocation9], %s1827_s29, %s1827_s29, %s1828_s30  }
  0x26   :  { %s1829_s17 = smov [#allocation11]   ;;  %s1830_s19 = smov [#allocation14]  }
  0x27   :  { %s78_s18 = sshll.u32 %s1829_s17, 4  ;;  %s100_s20 = sshll.u32 %s1830_s19, 4  ;;  %s79_s18 = int_to_ptr.vmem [resolvable:$true] %s78_s18  ;;  %s101_s20 = int_to_ptr.vmem [resolvable:$true] %s100_s20 }
  0x28   :  { %s1687_s21 = scalar_lea.vmem %s79_s18, 32  ;;  %p1692_p11 = scmp.lt.s32.totalorder %s79_s18, %s79_s18 }
  0x29   :  { %p1688_p10 = scmp.ne.s32.totalorder %s79_s18, %s1687_s21  ;;  %p1693_p12 = scmp.lt.s32.totalorder %s1687_s21, %s1687_s21 }
  0x2b   :  { %p1694_p13 = por %p1693_p12, %p1692_p11 }
  0x2d   :  { %p1695_p0 = pnand %p1694_p13, %p1688_p10 }
  0x2f   :  { %1698 = shalt.err (!%p1695_p0)
}
  0x30   :  { %81 = dma.hbm_to_vmem [thread:$0]  %s2128_s9, 32, %s79_s18, [#allocation12]  }
  0x31   :  { %s1707_s24 = scalar_lea.vmem %s101_s20, 32  ;;  %p1712_p2 = scmp.lt.s32.totalorder %s101_s20, %s101_s20 }
  0x32   :  { %p1708_p1 = scmp.ne.s32.totalorder %s101_s20, %s1707_s24  ;;  %p1713_p3 = scmp.lt.s32.totalorder %s1707_s24, %s1707_s24 }
  0x34   :  { %p1714_p4 = por %p1713_p3, %p1712_p2 }
  0x36   :  { %p1715_p5 = pnand %p1714_p4, %p1708_p1 }
  0x38   :  { %1718 = shalt.err (!%p1715_p5)
}
  0x39   :  { %103 = dma.hbm_to_vmem [thread:$0]  %s2130_s11, 32, %s101_s20, [#allocation15]  }
  0x3a   :  { %s1831_s26 = smov [#allocation6]   ;;  %s1832_s28 = smov [#allocation10]  }
  0x3b   :  { %s44_s27 = sshll.u32 %s1831_s26, 4  ;;  %s66_s29 = sshll.u32 %s1832_s28, 4  ;;  %s45_s27 = int_to_ptr.vmem [resolvable:$true] %s44_s27  ;;  %s67_s29 = int_to_ptr.vmem [resolvable:$true] %s66_s29 }
  0x3c   :  { %s1727_s30 = scalar_lea.vmem %s45_s27, 16  ;;  %s1731_s9 = scalar_lea.vmem %s45_s27, 32 }
  0x3d   :  { %p1728_p6 = scmp.ne.s32.totalorder %s45_s27, %s1727_s30  ;;  %p1732_p7 = scmp.lt.s32.totalorder %s45_s27, %s45_s27 }
  0x3e   :  { %p1733_p8 = scmp.lt.s32.totalorder %s1731_s9, %s1727_s30 }
  0x40   :  { %p1734_p9 = por %p1733_p8, %p1732_p7 }
  0x42   :  { %p1735_p10 = pnand %p1734_p9, %p1728_p6 }
  0x44   :  { %1738 = shalt.err (!%p1735_p10)
}
  0x45   :  { %47 = dma.hbm_to_vmem [thread:$0]  %s2124_s5, 16, %s45_s27, [#allocation7]  }
  0x46   :  { %s1747_s17 = scalar_lea.vmem %s67_s29, 16  ;;  %s1751_s11 = scalar_lea.vmem %s67_s29, 32 }
  0x47   :  { %p1748_p11 = scmp.ne.s32.totalorder %s67_s29, %s1747_s17  ;;  %p1752_p12 = scmp.lt.s32.totalorder %s67_s29, %s67_s29 }
  0x48   :  { %p1753_p13 = scmp.lt.s32.totalorder %s1751_s11, %s1747_s17 }
  0x4a   :  { %p1754_p0 = por %p1753_p13, %p1752_p12 }
  0x4c   :  { %p1755_p1 = pnand %p1754_p0, %p1748_p11 }
  0x4e   :  { %1758 = shalt.err (!%p1755_p1)
}
  0x4f   :  { %69 = dma.hbm_to_vmem [thread:$0]  %s2126_s7, 16, %s67_s29, [#allocation9]  }
  0x50   :  { %s1833_s20 = smov [#allocation13]  }
  0x51   :  { %s87_s21 = sshll.u32 %s1833_s20, 4  ;;  %s88_s21 = int_to_ptr.vmem [resolvable:$true] %s87_s21 }
  0x52   :  { %s1767_s22 = scalar_lea.vmem %s88_s21, 1024  ;;  %p1772_p3 = scmp.lt.s32.totalorder %s88_s21, %s88_s21 }
  0x53   :  { %p1768_p2 = scmp.ne.s32.totalorder %s88_s21, %s1767_s22  ;;  %p1773_p4 = scmp.lt.s32.totalorder %s1767_s22, %s1767_s22 }
  0x55   :  { %p1774_p5 = por %p1773_p4, %p1772_p3 }
  0x57   :  { %p1775_p6 = pnand %p1774_p5, %p1768_p2 }
  0x59   :  { %1778 = shalt.err (!%p1775_p6)
}
  0x5a   :  { %s1834_s5 = smov 128   ;;  %s1835_s23 = smov 8  }
  0x5b   :  { %93 = dma.hbm_to_vmem [thread:$0]  %s2129_s10, 1024, %s88_s21, [#allocation12], %s1834_s5, %s1834_s5, %s1835_s23  }
  0x5c   :  { %s1836_s25 = smov [#allocation16]  }
  0x5d   :  { %s114_s26 = sshll.u32 %s1836_s25, 4  ;;  %s115_s26 = int_to_ptr.vmem [resolvable:$true] %s114_s26 }
  0x5e   :  { %s1787_s7 = scalar_lea.vmem %s115_s26, 16  ;;  %s1791_s27 = scalar_lea.vmem %s115_s26, 32 }
  0x5f   :  { %p1788_p7 = scmp.ne.s32.totalorder %s115_s26, %s1787_s7  ;;  %p1792_p8 = scmp.lt.s32.totalorder %s115_s26, %s115_s26 }
  0x60   :  { %p1793_p9 = scmp.lt.s32.totalorder %s1791_s27, %s1787_s7 }
  0x62   :  { %p1794_p10 = por %p1793_p9, %p1792_p8 }
  0x64   :  { %p1795_p11 = pnand %p1794_p10, %p1788_p7 }
  0x66   :  { %1798 = shalt.err (!%p1795_p11)
}
  0x67   :  { %117 = dma.hbm_to_vmem [thread:$0]  %s2133_s14, 16, %s115_s26, [#allocation15]  }
  0x68   :  { %1801 = dma.done.wait [#allocation7], 16  }
  0x69   :  { %1802 = vsyncadd [#allocation7], 4294967280 }
  0x6a   :  { %1803 = dma.done.wait [#allocation9], 272  }
  0x6b   :  { %1804 = vsyncadd [#allocation9], 4294967024 }
  0x6c   :  { %1805 = dma.done.wait [#allocation12], 1056  }
  0x6d   :  { %1806 = vsyncadd [#allocation12], 4294966240 }
  0x6e   :  { %1807 = dma.done.wait [#allocation15], 48  }
  0x6f   :  { %1808 = vsyncadd [#allocation15], 4294967248  ;;  %s141_s10 = sld [smem:[#allocation5]] }
  0x75   :  { %s142_s2 = scalar_lea.vmem %s2122_s3, %s141_s10 }
  0x76   :  { %v161_v0 = vld [vmem:[%s142_s2] sm:$0x1] }
  0x77   :  { %162 = vst [vmem:[#allocation2] sm:$0x1] %v161_v0 }
  0x78   :  { %188 = vsyncadd [#allocation3], 16  ;;  %s1438_s0 = sld [smem:[#allocation5 + $0x1]] }
  0x7e   :  { %s191_s14 = scalar_lea.vmem %s2122_s3, %s1438_s0 }
  0x7f   :  { %v212_v1 = vld [vmem:[%s191_s14] sm:$0x1] }
  0x80   :  { %213 = vst [vmem:[#allocation2 + $0x1] sm:$0x1] %v212_v1 }
  0x81   :  { %239 = vsyncadd [#allocation3 + $0x1], 16  ;;  %s1439_s18 = sld [smem:[#allocation5 + $0x2]] }
  0x87   :  { %s242_s21 = scalar_lea.vmem %s2122_s3, %s1439_s18 }
  0x88   :  { %v263_v2 = vld [vmem:[%s242_s21] sm:$0x1] }
  0x89   :  { %264 = vst [vmem:[#allocation2 + $0x2] sm:$0x1] %v263_v2 }
  0x8a   :  { %290 = vsyncadd [#allocation3 + $0x2], 16  ;;  %s1440_s22 = sld [smem:[#allocation5 + $0x3]] }
  0x90   :  { %s293_s24 = scalar_lea.vmem %s2122_s3, %s1440_s22 }
  0x91   :  { %v314_v3 = vld [vmem:[%s293_s24] sm:$0x1] }
  0x92   :  { %315 = vst [vmem:[#allocation2 + $0x3] sm:$0x1] %v314_v3 }
  0x93   :  { %341 = vsyncadd [#allocation3 + $0x3], 16  ;;  %s1441_s6 = sld [smem:[#allocation5 + $0x4]] }
  0x99   :  { %s344_s7 = scalar_lea.vmem %s2122_s3, %s1441_s6 }
  0x9a   :  { %v365_v4 = vld [vmem:[%s344_s7] sm:$0x1] }
  0x9b   :  { %366 = vst [vmem:[#allocation2 + $0x4] sm:$0x1] %v365_v4 }
  0x9c   :  { %392 = vsyncadd [#allocation3 + $0x4], 16  ;;  %s1442_s27 = sld [smem:[#allocation5 + $0x5]] }
  0xa2   :  { %s395_s10 = scalar_lea.vmem %s2122_s3, %s1442_s27 }
  0xa3   :  { %v416_v5 = vld [vmem:[%s395_s10] sm:$0x1] }
  0xa4   :  { %417 = vst [vmem:[#allocation2 + $0x5] sm:$0x1] %v416_v5 }
  0xa5   :  { %443 = vsyncadd [#allocation3 + $0x5], 16  ;;  %s1443_s30 = sld [smem:[#allocation5 + $0x6]] }
  0xab   :  { %s446_s0 = scalar_lea.vmem %s2122_s3, %s1443_s30 }
  0xac   :  { %v467_v6 = vld [vmem:[%s446_s0] sm:$0x1] }
  0xad   :  { %468 = vst [vmem:[#allocation2 + $0x6] sm:$0x1] %v467_v6 }
  0xae   :  { %494 = vsyncadd [#allocation3 + $0x6], 16  ;;  %s1444_s17 = sld [smem:[#allocation5 + $0x7]] }
  0xb4   :  { %s497_s18 = scalar_lea.vmem %s2122_s3, %s1444_s17 }
  0xb5   :  { %v518_v7 = vld [vmem:[%s497_s18] sm:$0x1] }
  0xb6   :  { %519 = vst [vmem:[#allocation2 + $0x7] sm:$0x1] %v518_v7 }
  0xb7   :  { %545 = vsyncadd [#allocation3 + $0x7], 16 }
  0xb8   :  { %1809 = dma.done.wait [#allocation3], 16 }
  0xb9   :  { %1810 = vsyncadd [#allocation3], 4294967280 }
  0xba   :  { %1811 = dma.done.wait [#allocation3 + $0x1], 16 }
  0xbb   :  { %1812 = vsyncadd [#allocation3 + $0x1], 4294967280 }
  0xbc   :  { %1813 = dma.done.wait [#allocation3 + $0x2], 16 }
  0xbd   :  { %1814 = vsyncadd [#allocation3 + $0x2], 4294967280 }
  0xbe   :  { %1815 = dma.done.wait [#allocation3 + $0x3], 16 }
  0xbf   :  { %1816 = vsyncadd [#allocation3 + $0x3], 4294967280 }
  0xc0   :  { %1817 = dma.done.wait [#allocation3 + $0x4], 16 }
  0xc1   :  { %1818 = vsyncadd [#allocation3 + $0x4], 4294967280 }
  0xc2   :  { %1819 = dma.done.wait [#allocation3 + $0x5], 16 }
  0xc3   :  { %1820 = vsyncadd [#allocation3 + $0x5], 4294967280 }
  0xc4   :  { %1821 = dma.done.wait [#allocation3 + $0x6], 16 }
  0xc5   :  { %1822 = vsyncadd [#allocation3 + $0x6], 4294967280 }
  0xc6   :  { %1823 = dma.done.wait [#allocation3 + $0x7], 16 }
  0xc7   :  { %1824 = vsyncadd [#allocation3 + $0x7], 4294967280  ;;  %vm577_vm0 = vcmask 1040384   ;;  %v1837_v8 = vmov 0.0   ;;  %vm578_vm1 = vcmask 1041408   ;;  %v1838_v9 = vmov 65535  }
  0xc8   :  { %1555 = vmatprep.subr.bf16.mxu0 %v1837_v8  ;;  %v579_v10 = vsel %vm577_vm0, 4294967295, %v1838_v9  ;;  %vm1839_vm2 = vmmov 0   ;;  %v565_v12 = vld [vmem:[%s2123_s4] sm:$0x3]  ;;  %v1587_v16 = vld [vmem:[#allocation8 + $0x8] sm:$0xff]   ;;  %vm573_vm3 = vcmask 23552   ;;  %v701_v60 = vlaneseq }
  0xc9   :  { %1557 = vmatprep.mubr.msk.bf16.mxu0 %vm1839_vm2, %v1837_v8  ;;  %v580_v11 = vsel %vm578_vm1, %v579_v10, 0  ;;  %v563_v13 = vld [vmem:[%s2120_s1] sm:$0xff]  ;;  %v1589_v17 = vld [vmem:[#allocation13 + $0x34] ss:$8 sps:$4 sm:$0xff]   ;;  %v1591_v18 = vld [vmem:[#allocation13 + $0x30] ss:$8 sps:$4 sm:$0xff]  }
  0xca   :  { %v582_v14 = vand.u32 %v580_v11, %v565_v12  ;;  %v564_v15 = vpack.c.bf16 %v563_v13, %v563_v13  ;;  %v1588_v19 = vld [vmem:[#allocation8] sm:$0xff]   ;;  %848 = vmatprep.subr.bf16.mxu1 %v1589_v17  ;;  %v624_v21 = vld [vmem:[#allocation2] sm:$0xff]  ;;  %v1595_v23 = vld [vmem:[#allocation13 + $0x14] ss:$8 sps:$4 sm:$0xff]   ;;  %vm649_vm4 = vcmask 261120   ;;  %v1840_v28 = vmov 0  }
  0xcb   :  { %v1592_v20 = vld [vmem:[#allocation13 + $0x24] ss:$8 sps:$4 sm:$0xff]   ;;  %849 = vmatpush1.bf16.msra.mxu1 %v1591_v18  ;;  %v1594_v22 = vld [vmem:[#allocation13 + $0x20] ss:$8 sps:$4 sm:$0xff]   ;;  %v1597_v24 = vld [vmem:[#allocation13 + $0x10] ss:$8 sps:$4 sm:$0xff]   ;;  %v625_v25 = vpack.c.bf16 %v624_v21, %v624_v21  ;;  %872 = vmatprep.mubr.bf16.mxu1 %v1840_v28 }
  0xcc   :  { %1556 = vmatpush3.bf16.msra.mxu0 %v582_v14  ;;  %850 = vmatprep.subr.bf16.mxu1 %v1592_v20  ;;  %v1598_v26 = vld [vmem:[#allocation13 + $0x4] ss:$8 sps:$4 sm:$0xff]   ;;  %v1600_v27 = vld [vmem:[#allocation13] ss:$8 sps:$4 sm:$0xff]   ;;  %v1601_v30 = vld [vmem:[%s2127_s8 + $0x10] ss:$8 sps:$4 sm:$0xff]  }
  0xcd   :  { %1561 = vmatprep.subr.bf16.mxu0 %v1837_v8  ;;  %v1603_v29 = vld [vmem:[%s2127_s8 + $0x14] ss:$8 sps:$4 sm:$0xff]   ;;  %1585 = vset.pattern.permute.xlu1 %v1840_v28  ;;  %v1606_v31 = vld [vmem:[%s2127_s8 + $0x4] ss:$8 sps:$4 sm:$0xff]   ;;  %v1604_v32 = vld [vmem:[%s2127_s8] ss:$8 sps:$4 sm:$0xff]  }
  0xce   :  { %1586 = vset.pattern.permute.xlu0 %v1840_v28  ;;  %v1445_v33 = vld [vmem:[#allocation6] ss:$0 sm:$0xff]  ;;  %vm836_vm5 = vcmask 523264   ;;  %v1447_v40 = vld [vmem:[#allocation10] ss:$0 sm:$0xff]  ;;  %v1610_v51 = vld [vmem:[%s2131_s12 + $0x70] sm:$0xff]  }
  0xcf   :  { %1558 = vmatmul.mubr.msk.bf16.vlgmr.msra.gmra.mxu0 %vm573_vm3, %v564_v15  ;;  %851 = vmatpush1.bf16.msra.mxu1 %v1594_v22  ;;  %v1607_v48 = vld [vmem:[%s2131_s12 + $0x78] sm:$0xff]   ;;  %v1613_v53 = vld [vmem:[%s2132_s13 + $0x70] sm:$0xff]   ;;  %v1614_v56 = vld [vmem:[%s2131_s12 + $0x68] sm:$0xff]   ;;  %v2038_v62 = vshrl.u32 %v701_v60, 7  ;;  %s2139_s11 = sld [smem:[#allocation39_spill]]  ;;  %vm1274_vm8 = vcmask 7168  }
  0xd0   :  { %1562 = vmatpush3.bf16.msra.mxu0 %v1587_v16  ;;  %1565 = vmatprep.mubr.msk.bf16.mxu0 %vm1839_vm2, %v1837_v8  ;;  %v1608_v49 = vld [vmem:[%s2131_s12 + $0x38] sm:$0xff]   ;;  %v1612_v54 = vld [vmem:[%s2131_s12 + $0x30] sm:$0xff]   ;;  %v1617_v57 = vld [vmem:[%s2132_s13 + $0x68] sm:$0xff]  }
  0xd1   :  { %1563 = vmatprep.subr.bf16.mxu0 %v1837_v8  ;;  %852 = vmatprep.subr.bf16.mxu1 %v1595_v23  ;;  %v1609_v50 = vld [vmem:[%s2132_s13 + $0x78] sm:$0xff]   ;;  %v1615_v55 = vld [vmem:[%s2132_s13 + $0x30] sm:$0xff]   ;;  %v1616_v58 = vld [vmem:[%s2131_s12 + $0x28] sm:$0xff]   ;;  %v703_v2 = vsub.s32 0, %v2038_v62  ;;  %v707_v3 = vsub.s32 1, %v2038_v62  ;;  %vm1271_vm7 = vcmp.lt.s32.totalorder %v2038_v62, 2 }
  0xd2   :  { %v1611_v52 = vld [vmem:[%s2132_s13 + $0x38] sm:$0xff]   ;;  %v1618_v59 = vld [vmem:[%s2131_s12 + $0x60] sm:$0xff]  }
  0xd3   :  { %853 = vmatpush1.bf16.msra.mxu1 %v1597_v24  ;;  %v699_v1 = vld [vmem:[#allocation11] sm:$0x3]  ;;  %v784_v6 = vld [vmem:[#allocation14] sm:$0x3] }
  0xd4   :  { %1564 = vmatpush3.bf16.msra.mxu0 %v1588_v19  ;;  %854 = vmatprep.subr.bf16.mxu1 %v1598_v26  ;;  %v704_v5 = vrot.slane %v699_v1, %v703_v2  ;;  %v793_v7 = vrot.slane %v784_v6, %v707_v3  ;;  %v708_v9 = vrot.slane %v699_v1, %v707_v3  ;;  %v1620_v26 = vld [vmem:[%s2131_s12 + $0x20] sm:$0xff]  }
  0xd5   :  { %746 = vmatprep.subr.bf16.mxu0 %v1603_v29  ;;  %v789_v11 = vrot.slane %v784_v6, %v703_v2  ;;  %v1623_v29 = vld [vmem:[%s2132_s13 + $0x20] sm:$0xff]  }
  0xd6   :  { %v1497_v3 = vld [vmem:[#allocation16] ss:$0 sm:$0xff] }
  0xd7   :  { %1566 = vmatmul.mubr.msk.bf16.vlgmr.msra.gmra.mxu0 %vm649_vm4, %v625_v25  ;;  %855 = vmatpush1.bf16.msra.mxu1 %v1600_v27  ;;  %v1619_v25 = vld [vmem:[%s2132_s13 + $0x28] sm:$0xff]   ;;  %v1621_v27 = vld [vmem:[%s2132_s13 + $0x60] sm:$0xff]  }
  0xd8   :  { %766 = vmatprep.mubr.bf16.mxu0 %v1840_v28  ;;  %747 = vmatpush1.bf16.msra.mxu0 %v1601_v30  ;;  %v1622_v28 = vld [vmem:[%s2131_s12 + $0x58] sm:$0xff]  }
  0xd9   :  { %748 = vmatprep.subr.bf16.mxu0 %v1606_v31  ;;  %1533 = vmatprep.subr.bf16.mxu1 %v1607_v48  ;;  %v1624_v30 = vld [vmem:[%s2131_s12 + $0x18] sm:$0xff]  }
  0xda   :  { %v1625_v31 = vld [vmem:[%s2132_s13 + $0x58] sm:$0xff]  }
  0xdc   :  { %749 = vmatpush1.bf16.msra.mxu0 %v1604_v32  ;;  %v1626_v32 = vld [vmem:[%s2131_s12 + $0x50] sm:$0xff]  }
  0xdd   :  { %1511 = vmatprep.subr.bf16.mxu0 %v1609_v50 }
 0x18f   :  { %v618_v34 = vpop.f32.mrf.mxu0 }
 0x190   :  { %v619_v35 = vadd.f32 %v1445_v33, %v618_v34  ;;  %v1627_v33 = vld [vmem:[%s2132_s13 + $0x18] sm:$0xff]   ;;  %v1628_v34 = vld [vmem:[%s2131_s12 + $0x10] sm:$0xff]  }
 0x191   :  { %v1559_v36 = vpop.f32.mrf.mxu0 }
 0x192   :  { %v775_v37 = vpack.c.bf16 %v619_v35, %v619_v35  ;;  %v1629_v35 = vld [vmem:[%s2132_s13 + $0x50] sm:$0xff]   ;;  %v1630_v36 = vld [vmem:[%s2131_s12 + $0x48] sm:$0xff]  }
 0x193   :  { %v621_v38 = vpop.f32.mrf.mxu0 }
 0x194   :  { %1464 = vmatmul.mubr.msk.bf16.vlgmr.msra.gmra.mxu1 %vm836_vm5, %v775_v37  ;;  %v1631_v37 = vld [vmem:[%s2132_s13 + $0x10] sm:$0xff]   ;;  %v1632_v38 = vld [vmem:[%s2131_s12 + $0x8] sm:$0xff]  }
 0x195   :  { %v1560_v39 = vpop.f32.mrf.mxu0  ;;  %1534 = vmatpush3.bf16.msra.mxu1 %v1608_v49 }
 0x196   :  { %1535 = vmatprep.subr.bf16.mxu1 %v1610_v51  ;;  %v1633_v39 = vld [vmem:[%s2132_s13 + $0x48] sm:$0xff]  }
 0x197   :  { %v687_v41 = vpop.f32.mrf.mxu0 }
 0x198   :  { %v688_v42 = vadd.f32 %v1447_v40, %v687_v41  ;;  %v1634_v40 = vld [vmem:[%s2131_s12 + $0x40] sm:$0xff]   ;;  %v1635_v41 = vld [vmem:[%s2132_s13 + $0x8] sm:$0xff]  }
 0x199   :  { %v1567_v43 = vpop.f32.mrf.mxu0  ;;  %1536 = vmatpush3.bf16.msra.mxu1 %v1612_v54 }
 0x19a   :  { %v693_v44 = vmax.f32 %v688_v42, 0.0  ;;  %1537 = vmatprep.subr.bf16.mxu1 %v1614_v56  ;;  %v1636_v42 = vld [vmem:[%s2131_s12] sm:$0xff]  }
 0x19b   :  { %v690_v45 = vpop.f32.mrf.mxu0  ;;  %v1637_v43 = vld [vmem:[%s2132_s13 + $0x40] sm:$0xff]  }
 0x19c   :  { %v694_v46 = vpack.c.bf16 %v693_v44, %v693_v44  ;;  %v1638_v44 = vld [vmem:[%s2132_s13] sm:$0xff]  }
 0x19d   :  { %v1568_v47 = vpop.f32.mrf.mxu0  ;;  %1538 = vmatpush3.bf16.msra.mxu1 %v1616_v58 }
 0x19e   :  { %1455 = vmatmul.mubr.msk.bf16.vlgmr.msra.gmra.mxu0 %vm649_vm4, %v694_v46  ;;  %1539 = vmatprep.subr.bf16.mxu1 %v1618_v59 }
 0x19f   :  { %1512 = vmatpush3.bf16.msra.mxu0 %v1611_v52 }
 0x1a0   :  { %1513 = vmatprep.subr.bf16.mxu0 %v1613_v53 }
 0x1a1   :  { %1540 = vmatpush3.bf16.msra.mxu1 %v1620_v26 }
 0x1a2   :  { %1541 = vmatprep.subr.bf16.mxu1 %v1622_v28 }
 0x1a3   :  { %1514 = vmatpush3.bf16.msra.mxu0 %v1615_v55 }
 0x1a4   :  { %1515 = vmatprep.subr.bf16.mxu0 %v1617_v57 }
 0x1a5   :  { %1542 = vmatpush3.bf16.msra.mxu1 %v1624_v30 }
 0x1a6   :  { %1543 = vmatprep.subr.bf16.mxu1 %v1626_v32 }
 0x1a7   :  { %1516 = vmatpush3.bf16.msra.mxu0 %v1619_v25 }
 0x1a8   :  { %1517 = vmatprep.subr.bf16.mxu0 %v1621_v27 }
 0x1a9   :  { %1544 = vmatpush3.bf16.msra.mxu1 %v1628_v34 }
 0x1aa   :  { %1545 = vmatprep.subr.bf16.mxu1 %v1630_v36 }
 0x1ab   :  { %1518 = vmatpush3.bf16.msra.mxu0 %v1623_v29 }
 0x1ac   :  { %1519 = vmatprep.subr.bf16.mxu0 %v1625_v31 }
 0x1ad   :  { %1546 = vmatpush3.bf16.msra.mxu1 %v1632_v38 }
 0x1ae   :  { %1547 = vmatprep.subr.bf16.mxu1 %v1634_v40 }
 0x1af   :  { %1520 = vmatpush3.bf16.msra.mxu0 %v1627_v33 }
 0x1b0   :  { %1521 = vmatprep.subr.bf16.mxu0 %v1629_v35 }
 0x1b1   :  { %1548 = vmatpush3.bf16.msra.mxu1 %v1636_v42 }
 0x1b3   :  { %1522 = vmatpush3.bf16.msra.mxu0 %v1631_v37 }
 0x1b4   :  { %1523 = vmatprep.subr.bf16.mxu0 %v1633_v39 }
 0x1b7   :  { %1524 = vmatpush3.bf16.msra.mxu0 %v1635_v41 }
 0x1b8   :  { %1525 = vmatprep.subr.bf16.mxu0 %v1637_v43 }
 0x1bb   :  { %1526 = vmatpush3.bf16.msra.mxu0 %v1638_v44 }
 0x254   :  { %v874_v61 = vpop.f32.mrf.mxu1 }
 0x255   :  { %v875_v17 = vadd.f32 %v874_v61, %v789_v11 }
 0x256   :  { %v876_v63 = vpop.f32.mrf.mxu1 }
 0x257   :  { %v2042_v14 = vadd.f32 %v876_v63, %v793_v7  ;;  %v889_v23 = vmul.f32 %v875_v17, %v875_v17 }
 0x258   :  { %v878_v0 = vpop.f32.mrf.mxu1 }
 0x259   :  { %v890_v21 = vmul.f32 %v2042_v14, %v2042_v14 }
 0x25a   :  { %v879_v4 = vpop.f32.mrf.mxu1 }
 0x25b   :  { %v891_v24 = vadd.f32 %v890_v21, %v889_v23 }
 0x25e   :  { %v768_v10 = vpop.f32.mrf.mxu0 }
 0x25f   :  { %v769_v12 = vadd.f32 %v768_v10, %v704_v5 }
 0x260   :  { %v770_v13 = vpop.f32.mrf.mxu0 }
 0x261   :  { %v771_v15 = vadd.f32 %v770_v13, %v708_v9  ;;  %v881_v18 = vmul.f32 %v769_v12, %v769_v12  ;;  %v1258_v9 = vld [vmem:[%s2139_s11] sm:$0xff]  ;;  %v1257_v13 = vand.u32 127, %v701_v60 }
 0x262   :  { %v772_v16 = vpop.f32.mrf.mxu0 }
 0x263   :  { %v882_v19 = vmul.f32 %v771_v15, %v771_v15 }
 0x264   :  { %v773_v20 = vpop.f32.mrf.mxu0 }
 0x265   :  { %v883_v22 = vadd.f32 %v882_v19, %v881_v18 }
 0x267   :  { %884 = vadd.xlane.f32.xlu0 %v883_v22 }
 0x26b   :  { %892 = vadd.xlane.f32.xlu0 %v891_v24 }
 0x2f0   :  { %v885_v45 = vpop.xlane.xlu0 %884 }
 0x2f1   :  { %1639 = vrsqrt.f32 %v885_v45 }
 0x2f4   :  { %v893_v46 = vpop.xlane.xlu0 %892 }
 0x2f5   :  { %1641 = vrsqrt.f32 %v893_v46 }
 0x2fe   :  { %v1640_v47 = vpop.eup %1639 }
 0x2ff   :  { %v888_v48 = vmul.f32 %v1640_v47, %v771_v15  ;;  %v887_v49 = vmul.f32 %v1640_v47, %v769_v12 }
 0x301   :  { %v898_v50 = vpack.c.bf16 %v888_v48, %v888_v48  ;;  %v897_v51 = vpack.c.bf16 %v887_v49, %v887_v49 }
 0x302   :  { %v1642_v52 = vpop.eup %1641 }
 0x303   :  { %1229 = vmatprep.mubr.bf16.mxu1 %v898_v50  ;;  %v896_v53 = vmul.f32 %v1642_v52, %v2042_v14  ;;  %v895_v54 = vmul.f32 %v1642_v52, %v875_v17 }
 0x304   :  { %1230 = vmatmul.mubr.bf16.vlgmr.msra.gmra.mxu1 %v897_v51 }
 0x305   :  { %v932_v55 = vpack.c.bf16 %v896_v53, %v896_v53  ;;  %v931_v56 = vpack.c.bf16 %v895_v54, %v895_v54 }
 0x307   :  { %1093 = vmatprep.mubr.bf16.mxu0 %v932_v55 }
 0x308   :  { %1094 = vmatmul.mubr.bf16.vlgmr.msra.gmra.mxu0 %v931_v56 }
 0x3c4   :  { %v1549_v57 = vpop.f32.mrf.mxu1 }
 0x3c6   :  { %v1550_v58 = vpop.f32.mrf.mxu1 }
 0x3c7   :  { %v1551_v1 = vadd.f32 %v1550_v58, %v1549_v57 }
 0x3c8   :  { %v1527_v59 = vpop.f32.mrf.mxu0  ;;  %v1552_v61 = vpop.f32.mrf.mxu1 }
 0x3ca   :  { %v1528_v63 = vpop.f32.mrf.mxu0  ;;  %v1553_v0 = vpop.f32.mrf.mxu1 }
 0x3cb   :  { %v1529_v2 = vadd.f32 %v1528_v63, %v1527_v59 }
 0x3cc   :  { %v1530_v4 = vpop.f32.mrf.mxu0 }
 0x3cd   :  { %v1232_v5 = vadd.f32 %v1551_v1, %v1529_v2 }
 0x3ce   :  { %v1531_v6 = vpop.f32.mrf.mxu0 }
 0x3cf   :  { %v1244_v7 = vadd.f32 %v1497_v3, %v1232_v5 }
 0x3d1   :  { %1245 = vst [vmem:[%s2134_s15] sm:$0xff] %v1244_v7  ;;  %1246 = vmax.xlane.f32.xlu1 %v1244_v7 }
 0x3e2   :  { %1260 = vperm.xlu1 %1585, %v1258_v9  }
 0x45a   :  { %v1247_v10 = vpop.xlane.xlu1 %1246 }
 0x45b   :  { %v1248_v11 = vsub.f32 %v1244_v7, %v1247_v10 }
 0x45d   :  { %v1249_v12 = vmul.f32 1.442695, %v1248_v11 }
 0x45e   :  { %v1261_v14 = vpop.permute.xlu1 %1260 }
 0x45f   :  { %1643 = vpow2.f32 %v1249_v12  ;;  %vm1262_vm6 = vcmp.eq.s32.totalorder %v1257_v13, %v1261_v14 }
 0x460   :  { %v1263_v16 = vsel %vm1262_vm6, 1.0, %v1837_v8 }
 0x461   :  { %v1264_v17 = vmul.f32 %v1263_v16, %v1244_v7 }
 0x46c   :  { %v1644_v15 = vpop.eup %1643 }
 0x46d   :  { %1251 = vadd.xlane.f32.xlu0 %v1644_v15 }
 0x471   :  { %1265 = vadd.xlane.f32.xlu0 %v1264_v17 }
 0x4f6   :  { %v1252_v18 = vpop.xlane.xlu0 %1251 }
 0x4f7   :  { %1645 = vlog2.f32 %v1252_v18 }
 0x4fa   :  { %v1266_v22 = vpop.xlane.xlu0 %1265 }
 0x504   :  { %v1646_v19 = vpop.eup %1645 }
 0x505   :  { %v1254_v20 = vmul.f32 0.6931472, %v1646_v19 }
 0x507   :  { %v1255_v21 = vadd.f32 %v1254_v20, %v1247_v10 }
 0x509   :  { %v1272_v23 = vsub.f32 %v1255_v21, %v1266_v22 }
 0x50b   :  { %v1273_v24 = vsel %vm1271_vm7, %v1272_v23, 0.0 }
 0x50c   :  { %1275 = vst.msk [vmem:[%s2135_s16] sm:$0xff] %vm1274_vm8, %v1273_v24 }
 0x50d   :  { %1284 = vsyncpa [#allocation7], 1 }
 0x50e   :  { %1285 = vsyncpa [#allocation9], 1 }
 0x50f   :  { %1286 = vsyncpa [#allocation12], 1 }
 0x510   :  { %1287 = vsyncpa [#allocation15], 1 }
 0x511   :  { %1288 = vsyncmov [#allocation3] }
 0x514   :  { %s1289_s18 = vpop.sfrf %1288 }
 0x515   :  { %p1498_p12 = scmp.ne.s32.totalorder %s1289_s18, 0 }
 0x517   :  { %1293 = shalt.err (%p1498_p12)  }
 0x518   :  { %1295 = vsyncmov [#allocation3 + $0x1] }
 0x51b   :  { %s1296_s3 = vpop.sfrf %1295 }
 0x51c   :  { %p1499_p13 = scmp.ne.s32.totalorder %s1296_s3, 0 }
 0x51e   :  { %1300 = shalt.err (%p1499_p13)  }
 0x51f   :  { %1302 = vsyncmov [#allocation3 + $0x2] }
 0x522   :  { %s1303_s19 = vpop.sfrf %1302 }
 0x523   :  { %p1500_p0 = scmp.ne.s32.totalorder %s1303_s19, 0 }
 0x525   :  { %1307 = shalt.err (%p1500_p0)  }
 0x526   :  { %1309 = vsyncmov [#allocation3 + $0x3] }
 0x529   :  { %s1310_s20 = vpop.sfrf %1309 }
 0x52a   :  { %p1501_p1 = scmp.ne.s32.totalorder %s1310_s20, 0 }
 0x52c   :  { %1314 = shalt.err (%p1501_p1)  }
 0x52d   :  { %1316 = vsyncmov [#allocation3 + $0x4] }
 0x530   :  { %s1317_s16 = vpop.sfrf %1316 }
 0x531   :  { %p1502_p2 = scmp.ne.s32.totalorder %s1317_s16, 0 }
 0x533   :  { %1321 = shalt.err (%p1502_p2)  }
 0x534   :  { %1323 = vsyncmov [#allocation3 + $0x5] }
 0x537   :  { %s1324_s21 = vpop.sfrf %1323 }
 0x538   :  { %p1503_p3 = scmp.ne.s32.totalorder %s1324_s21, 0 }
 0x53a   :  { %1328 = shalt.err (%p1503_p3)  }
 0x53b   :  { %1330 = vsyncmov [#allocation3 + $0x6] }
 0x53e   :  { %s1331_s1 = vpop.sfrf %1330 }
 0x53f   :  { %p1504_p4 = scmp.ne.s32.totalorder %s1331_s1, 0 }
 0x541   :  { %1335 = shalt.err (%p1504_p4)  }
 0x542   :  { %1337 = vsyncmov [#allocation3 + $0x7] }
 0x545   :  { %s1338_s4 = vpop.sfrf %1337 }
 0x546   :  { %p1505_p5 = scmp.ne.s32.totalorder %s1338_s4, 0 }
 0x548   :  { %1342 = shalt.err (%p1505_p5)  }

</bundles_post_ra>
